<compile_context>
chip_gen: v5e
topology: v5e:2x2
jax: 0.10.0
libtpu: 0.0.40
codegen_flags: <defaults>
</compile_context>

<pallas_src>
import functools

import jax
import jax.numpy as jnp
from jax import lax
from jax.experimental import pallas as pl
from jax.experimental.pallas import tpu as pltpu

_EPS = 1e-5          # InstanceNorm2d default eps
_NEG_SLOPE = 0.1     # leaky_relu negative_slope
_MXU_MIN_C = 128     # below this the VPU broadcast-MAC path wins


def _roll_last(x, shift):
    """np.roll(x, shift, axis=-1) with a static shift.

    Written as two static lane slices + concat (unambiguous semantics);
    Mosaic turns this into XLU lane rotates (same hardware path as pltpu.roll).
    """
    n = x.shape[-1]
    shift = shift % n
    if shift == 0:
        return x
    return jnp.concatenate(
        [lax.slice_in_dim(x, n - shift, n, axis=-1),
         lax.slice_in_dim(x, 0, n - shift, axis=-1)], axis=-1)


def _reflect_shift(y, delta, size, stride, pos):
    """Shift one spatial coordinate of a flat (.., H*W) value by `delta` with
    ReflectionPad semantics (edge not repeated).

    y:      (..., H*W) value, row-major n = h*W + w on the lane axis.
    delta:  static coordinate shift (rows: stride=W, cols: stride=1).
    size:   extent of that coordinate (H or W).
    pos:    (1, H*W) int32 vector holding that coordinate for every flat slot.
    """
    if delta == 0:
        return y
    out = _roll_last(y, -delta * stride)          # value at coordinate p + delta
    # Fix the |delta| coordinates that fell off the edge: they must read the
    # reflected source coordinate instead.
    targets = range(size - delta, size) if delta > 0 else range(0, -delta)
    for pt in targets:
        ps = 2 * (size - 1) - (pt + delta) if delta > 0 else -(pt + delta)
        fix = _roll_last(y, -(ps - pt) * stride)
        out = jnp.where(pos == pt, fix, out)
    return out


def _mix_channels(acc, wk, tap):
    """acc += einsum('oc,bcn->bon', wk, tap).  Dispatch MXU vs VPU on C."""
    b, C, HW = tap.shape
    if C >= _MXU_MIN_C:
        # Accumulated per-tap MXU matmuls: bf16 operands, f32 accumulation.
        wk16 = wk.astype(jnp.bfloat16)
        upd = jnp.stack(
            [jnp.dot(wk16, tap[bb].astype(jnp.bfloat16),
                     preferred_element_type=jnp.float32) for bb in range(b)],
            axis=0)
        return acc + upd
    # Small C: outer-product broadcast-MACs on the VPU over full lane-dense vregs.
    for c in range(C):
        acc = acc + wk[:, c:c + 1].reshape(1, C, 1) * tap[:, c:c + 1, :]
    return acc


def _conv3x3_reflect(x, w9, d, H, W, row_pos, col_pos):
    """ReflectionPad2d(d) + 3x3 conv (dilation d, no bias) on a lane-dense
    (b, C, H*W) value.  Each of the 9 taps is built (rolled) and immediately
    consumed into the accumulator — no im2col tensor is ever materialized."""
    b, C, HW = x.shape
    acc = jnp.zeros((b, C, HW), jnp.float32)
    for kx in range(3):
        dx = (kx - 1) * d
        xc = _reflect_shift(x, dx, W, 1, col_pos)         # column shift, reused 3x
        for ky in range(3):
            dy = (ky - 1) * d
            tap = _reflect_shift(xc, dy, H, W, row_pos)   # row shift
            acc = _mix_channels(acc, w9[ky * 3 + kx], tap)
    return acc


def _instance_norm(y):
    """InstanceNorm2d (affine=False) over the flat H*W lane axis, two-pass."""
    inv_n = 1.0 / y.shape[-1]
    mean = jnp.sum(y, axis=-1, keepdims=True) * inv_n
    yc = y - mean
    var = jnp.sum(yc * yc, axis=-1, keepdims=True) * inv_n
    return yc * lax.rsqrt(var + _EPS)


def _res_conv_block_kernel(x_ref, w1_ref, w2_ref, rc_ref, o_ref, *,
                           C, H, W, dilation):
    x = x_ref[...].astype(jnp.float32)                    # (b_blk, C, H*W)
    rc = rc_ref[...]                                      # (2, H*W) int32
    row_pos = rc[0:1, :]                                  # (1, H*W)
    col_pos = rc[1:2, :]

    y = _conv3x3_reflect(x, w1_ref[...], dilation, H, W, row_pos, col_pos)
    y = _instance_norm(y)
    y = jnp.maximum(y, _NEG_SLOPE * y)                    # LeakyReLU(0.1)

    y = _conv3x3_reflect(y, w2_ref[...], 1, H, W, row_pos, col_pos)
    y = _instance_norm(y)

    o_ref[...] = x + y                                    # residual, lane-dense store


def res_conv_block(x, w1, b1, w2, b2, *, dilation=1):
    """ResConvBlock forward.  b1/b2 are accepted for API parity but are NOT sent
    to the kernel: a per-channel constant added right before InstanceNorm
    (affine=False) is exactly removed by its mean subtraction."""
    del b1, b2
    B, C, H, W = x.shape
    assert min(H, W) >= 2 and 1 <= dilation <= min(H, W) - 1, \
        "reflection padding needs pad < spatial size"
    HW = H * W

    # ---- batch blocking ----------------------------------------------------
    # In-kernel live set ~= a handful of (b_blk, C, HW) f32 values (x, the
    # rolled tap, the accumulator, y) plus the double-buffered in/out blocks;
    # budget <= ~4 MiB of block working set so every generation (incl. v7x's
    # 64 MiB physical / 32 MiB scoped default) has ample headroom.
    per_sample = C * HW * 4
    work_mult = 10
    b_blk = max(1, (4 << 20) // (per_sample * work_mult))
    b_blk = min(b_blk, B)
    if B >= 2:
        b_blk = min(b_blk, B // 2)        # >= 2 grid steps -> both v7x TensorCores
        b_blk = max(b_blk, 1)
    while B % b_blk:
        b_blk -= 1
    nb = B // b_blk

    # ---- layout plumbing: free reshapes only, no activation transposes ------
    x3 = x.reshape(B, C, HW).astype(jnp.float32)

    def w9(w):  # (O, I, 3, 3) -> (9, O, I) with k = ky*3 + kx  (tiny tensor)
        return jnp.transpose(w, (2, 3, 0, 1)).reshape(9, C, C).astype(jnp.float32)

    # (row, col) coordinate of every flat h*W + w slot, for the reflection fix.
    rows = jnp.repeat(jnp.arange(H, dtype=jnp.int32), W)
    cols = jnp.tile(jnp.arange(W, dtype=jnp.int32), H)
    rc = jnp.stack([rows, cols], axis=0)                  # (2, HW) int32

    kernel = functools.partial(_res_conv_block_kernel, C=C, H=H, W=W,
                               dilation=dilation)

    out3 = pl.pallas_call(
        kernel,
        out_shape=jax.ShapeDtypeStruct((B, C, HW), jnp.float32),
        grid=(nb,),
        in_specs=[
            pl.BlockSpec((b_blk, C, HW), lambda i: (i, 0, 0)),   # activations
            pl.BlockSpec((9, C, C), lambda i: (0, 0, 0)),        # conv1 weights
            pl.BlockSpec((9, C, C), lambda i: (0, 0, 0)),        # conv2 weights
            pl.BlockSpec((2, HW), lambda i: (0, 0)),             # row/col indices
        ],
        out_specs=pl.BlockSpec((b_blk, C, HW), lambda i: (i, 0, 0)),
        compiler_params=pltpu.CompilerParams(
            dimension_semantics=("parallel",)),
    )(x3, w9(w1), w9(w2), rc)

    return out3.reshape(B, C, H, W).astype(x.dtype)


def _reference(x, w1, b1, w2, b2, *, dilation=1):
    """Pure-JAX reference mirroring the PyTorch forward (with biases)."""
    def refl(a, p):
        return jnp.pad(a, ((0, 0), (0, 0), (p, p), (p, p)), mode="reflect")

    def conv(a, w, b, dil):
        out = lax.conv_general_dilated(
            a, w, window_strides=(1, 1), padding="VALID",
            rhs_dilation=(dil, dil),
            dimension_numbers=("NCHW", "OIHW", "NCHW"))
        return out + b[None, :, None, None]

    def inorm(a):
        m = jnp.mean(a, axis=(2, 3), keepdims=True)
        v = jnp.mean((a - m) ** 2, axis=(2, 3), keepdims=True)
        return (a - m) / jnp.sqrt(v + _EPS)

    y = conv(refl(x, dilation), w1, b1, dilation)
    y = inorm(y)
    y = jnp.where(y >= 0, y, _NEG_SLOPE * y)
    y = conv(refl(y, 1), w2, b2, 1)
    y = inorm(y)
    return x + y


if __name__ == "__main__":
    key = jax.random.PRNGKey(0)
    kx, kw1, kb1, kw2, kb2 = jax.random.split(key, 5)

    B, C, H, W = 2, 4, 16, 16
    dilation = 1

    x = jax.random.normal(kx, (B, C, H, W), jnp.float32)
    w1 = 0.2 * jax.random.normal(kw1, (C, C, 3, 3), jnp.float32)
    b1 = 0.1 * jax.random.normal(kb1, (C,), jnp.float32)
    w2 = 0.2 * jax.random.normal(kw2, (C, C, 3, 3), jnp.float32)
    b2 = 0.1 * jax.random.normal(kb2, (C,), jnp.float32)

    out = res_conv_block(x, w1, b1, w2, b2, dilation=dilation)
    out = jax.block_until_ready(out)

    ref = _reference(x, w1, b1, w2, b2, dilation=dilation)
    assert out.shape == (B, C, H, W)
    if not jnp.allclose(out, ref, atol=3e-4, rtol=3e-4):
        err = float(jnp.max(jnp.abs(out - ref)))
        raise AssertionError(f"mismatch, max abs err = {err}")
    print("KERNEL_OK")
</pallas_src>

<mosaic_0001>
module attributes {stable_mosaic.version = 11 : i64} {
  func.func @_res_conv_block_kernel(%arg0: i32, %arg1: memref<1x4x256xf32, #tpu.memory_space<vmem>>, %arg2: memref<9x4x4xf32, #tpu.memory_space<vmem>>, %arg3: memref<9x4x4xf32, #tpu.memory_space<vmem>>, %arg4: memref<2x256xi32, #tpu.memory_space<vmem>>, %arg5: memref<1x4x256xf32, #tpu.memory_space<vmem>>) attributes {dimension_semantics = [#tpu.dimension_semantics<parallel>], iteration_bounds = array<i64: 2>, scalar_prefetch = 0 : i64, scratch_operands = 0 : i64, tpu.core_type = #tpu.core_type<tc>, window_params = [{transform_indices = @transform_0, window_bounds = array<i64: 1, 4, 256>}, {pipeline_mode = #tpu.pipeline_mode<synchronous>, transform_indices = @transform_1, window_bounds = array<i64: 9, 4, 4>}, {pipeline_mode = #tpu.pipeline_mode<synchronous>, transform_indices = @transform_2, window_bounds = array<i64: 9, 4, 4>}, {pipeline_mode = #tpu.pipeline_mode<synchronous>, transform_indices = @transform_3, window_bounds = array<i64: 2, 256>}, {transform_indices = @transform_4, window_bounds = array<i64: 1, 4, 256>}]} {
    %c0 = arith.constant 0 : index
    %c0_0 = arith.constant 0 : index
    %c0_1 = arith.constant 0 : index
    %0 = vector.load %arg1[%c0, %c0_0, %c0_1] : memref<1x4x256xf32, #tpu.memory_space<vmem>>, vector<1x4x256xf32>
    %c0_2 = arith.constant 0 : index
    %c0_3 = arith.constant 0 : index
    %1 = vector.load %arg4[%c0_2, %c0_3] : memref<2x256xi32, #tpu.memory_space<vmem>>, vector<2x256xi32>
    %2 = vector.extract_strided_slice %1 {offsets = [0, 0], sizes = [1, 256], strides = [1, 1]} : vector<2x256xi32> to vector<1x256xi32>
    %3 = vector.extract_strided_slice %1 {offsets = [1, 0], sizes = [1, 256], strides = [1, 1]} : vector<2x256xi32> to vector<1x256xi32>
    %c0_4 = arith.constant 0 : index
    %c0_5 = arith.constant 0 : index
    %c0_6 = arith.constant 0 : index
    %4 = vector.load %arg2[%c0_4, %c0_5, %c0_6] : memref<9x4x4xf32, #tpu.memory_space<vmem>>, vector<9x4x4xf32>
    %cst = arith.constant 0.000000e+00 : f32
    %5 = vector.broadcast %cst : f32 to vector<1x4x256xf32>
    %6 = vector.extract_strided_slice %0 {offsets = [0, 0, 255], sizes = [1, 4, 1], strides = [1, 1, 1]} : vector<1x4x256xf32> to vector<1x4x1xf32>
    %7 = vector.extract_strided_slice %0 {offsets = [0, 0, 0], sizes = [1, 4, 255], strides = [1, 1, 1]} : vector<1x4x256xf32> to vector<1x4x255xf32>
    %8 = tpu.concatenate %6, %7 in 2 : vector<1x4x1xf32>, vector<1x4x255xf32> -> vector<1x4x256xf32>
    %9 = vector.extract_strided_slice %0 {offsets = [0, 0, 1], sizes = [1, 4, 255], strides = [1, 1, 1]} : vector<1x4x256xf32> to vector<1x4x255xf32>
    %10 = vector.extract_strided_slice %0 {offsets = [0, 0, 0], sizes = [1, 4, 1], strides = [1, 1, 1]} : vector<1x4x256xf32> to vector<1x4x1xf32>
    %11 = tpu.concatenate %9, %10 in 2 : vector<1x4x255xf32>, vector<1x4x1xf32> -> vector<1x4x256xf32>
    %c0_i32 = arith.constant 0 : i32
    %12 = vector.broadcast %c0_i32 : i32 to vector<1x256xi32>
    %13 = arith.cmpi eq, %3, %12 : vector<1x256xi32>
    %14 = vector.shape_cast %13 : vector<1x256xi1> to vector<1x1x256xi1>
    %15 = vector.broadcast %14 : vector<1x1x256xi1> to vector<1x4x256xi1>
    %16 = arith.select %15, %11, %8 : vector<1x4x256xi1>, vector<1x4x256xf32>
    %17 = vector.extract_strided_slice %16 {offsets = [0, 0, 240], sizes = [1, 4, 16], strides = [1, 1, 1]} : vector<1x4x256xf32> to vector<1x4x16xf32>
    %18 = vector.extract_strided_slice %16 {offsets = [0, 0, 0], sizes = [1, 4, 240], strides = [1, 1, 1]} : vector<1x4x256xf32> to vector<1x4x240xf32>
    %19 = tpu.concatenate %17, %18 in 2 : vector<1x4x16xf32>, vector<1x4x240xf32> -> vector<1x4x256xf32>
    %20 = vector.extract_strided_slice %16 {offsets = [0, 0, 16], sizes = [1, 4, 240], strides = [1, 1, 1]} : vector<1x4x256xf32> to vector<1x4x240xf32>
    %21 = vector.extract_strided_slice %16 {offsets = [0, 0, 0], sizes = [1, 4, 16], strides = [1, 1, 1]} : vector<1x4x256xf32> to vector<1x4x16xf32>
    %22 = tpu.concatenate %20, %21 in 2 : vector<1x4x240xf32>, vector<1x4x16xf32> -> vector<1x4x256xf32>
    %c0_i32_7 = arith.constant 0 : i32
    %23 = vector.broadcast %c0_i32_7 : i32 to vector<1x256xi32>
    %24 = arith.cmpi eq, %2, %23 : vector<1x256xi32>
    %25 = vector.shape_cast %24 : vector<1x256xi1> to vector<1x1x256xi1>
    %26 = vector.broadcast %25 : vector<1x1x256xi1> to vector<1x4x256xi1>
    %27 = arith.select %26, %22, %19 : vector<1x4x256xi1>, vector<1x4x256xf32>
    %28 = vector.extract_strided_slice %4 {offsets = [0, 0, 0], sizes = [1, 4, 4], strides = [1, 1, 1]} : vector<9x4x4xf32> to vector<1x4x4xf32>
    %29 = vector.shape_cast %28 : vector<1x4x4xf32> to vector<4x4xf32>
    %30 = vector.extract_strided_slice %29 {offsets = [0, 0], sizes = [4, 1], strides = [1, 1]} : vector<4x4xf32> to vector<4x1xf32>
    %31 = vector.shape_cast %30 : vector<4x1xf32> to vector<1x4x1xf32>
    %32 = vector.extract_strided_slice %27 {offsets = [0, 0, 0], sizes = [1, 1, 256], strides = [1, 1, 1]} : vector<1x4x256xf32> to vector<1x1x256xf32>
    %33 = vector.broadcast %31 : vector<1x4x1xf32> to vector<1x4x256xf32>
    %34 = vector.broadcast %32 : vector<1x1x256xf32> to vector<1x4x256xf32>
    %35 = arith.mulf %33, %34 : vector<1x4x256xf32>
    %36 = arith.addf %5, %35 : vector<1x4x256xf32>
    %37 = vector.extract_strided_slice %29 {offsets = [0, 1], sizes = [4, 1], strides = [1, 1]} : vector<4x4xf32> to vector<4x1xf32>
    %38 = vector.shape_cast %37 : vector<4x1xf32> to vector<1x4x1xf32>
    %39 = vector.extract_strided_slice %27 {offsets = [0, 1, 0], sizes = [1, 1, 256], strides = [1, 1, 1]} : vector<1x4x256xf32> to vector<1x1x256xf32>
    %40 = vector.broadcast %38 : vector<1x4x1xf32> to vector<1x4x256xf32>
    %41 = vector.broadcast %39 : vector<1x1x256xf32> to vector<1x4x256xf32>
    %42 = arith.mulf %40, %41 : vector<1x4x256xf32>
    %43 = arith.addf %36, %42 : vector<1x4x256xf32>
    %44 = vector.extract_strided_slice %29 {offsets = [0, 2], sizes = [4, 1], strides = [1, 1]} : vector<4x4xf32> to vector<4x1xf32>
    %45 = vector.shape_cast %44 : vector<4x1xf32> to vector<1x4x1xf32>
    %46 = vector.extract_strided_slice %27 {offsets = [0, 2, 0], sizes = [1, 1, 256], strides = [1, 1, 1]} : vector<1x4x256xf32> to vector<1x1x256xf32>
    %47 = vector.broadcast %45 : vector<1x4x1xf32> to vector<1x4x256xf32>
    %48 = vector.broadcast %46 : vector<1x1x256xf32> to vector<1x4x256xf32>
    %49 = arith.mulf %47, %48 : vector<1x4x256xf32>
    %50 = arith.addf %43, %49 : vector<1x4x256xf32>
    %51 = vector.extract_strided_slice %29 {offsets = [0, 3], sizes = [4, 1], strides = [1, 1]} : vector<4x4xf32> to vector<4x1xf32>
    %52 = vector.shape_cast %51 : vector<4x1xf32> to vector<1x4x1xf32>
    %53 = vector.extract_strided_slice %27 {offsets = [0, 3, 0], sizes = [1, 1, 256], strides = [1, 1, 1]} : vector<1x4x256xf32> to vector<1x1x256xf32>
    %54 = vector.broadcast %52 : vector<1x4x1xf32> to vector<1x4x256xf32>
    %55 = vector.broadcast %53 : vector<1x1x256xf32> to vector<1x4x256xf32>
    %56 = arith.mulf %54, %55 : vector<1x4x256xf32>
    %57 = arith.addf %50, %56 : vector<1x4x256xf32>
    %58 = vector.extract_strided_slice %4 {offsets = [3, 0, 0], sizes = [1, 4, 4], strides = [1, 1, 1]} : vector<9x4x4xf32> to vector<1x4x4xf32>
    %59 = vector.shape_cast %58 : vector<1x4x4xf32> to vector<4x4xf32>
    %60 = vector.extract_strided_slice %59 {offsets = [0, 0], sizes = [4, 1], strides = [1, 1]} : vector<4x4xf32> to vector<4x1xf32>
    %61 = vector.shape_cast %60 : vector<4x1xf32> to vector<1x4x1xf32>
    %62 = vector.extract_strided_slice %16 {offsets = [0, 0, 0], sizes = [1, 1, 256], strides = [1, 1, 1]} : vector<1x4x256xf32> to vector<1x1x256xf32>
    %63 = vector.broadcast %61 : vector<1x4x1xf32> to vector<1x4x256xf32>
    %64 = vector.broadcast %62 : vector<1x1x256xf32> to vector<1x4x256xf32>
    %65 = arith.mulf %63, %64 : vector<1x4x256xf32>
    %66 = arith.addf %57, %65 : vector<1x4x256xf32>
    %67 = vector.extract_strided_slice %59 {offsets = [0, 1], sizes = [4, 1], strides = [1, 1]} : vector<4x4xf32> to vector<4x1xf32>
    %68 = vector.shape_cast %67 : vector<4x1xf32> to vector<1x4x1xf32>
    %69 = vector.extract_strided_slice %16 {offsets = [0, 1, 0], sizes = [1, 1, 256], strides = [1, 1, 1]} : vector<1x4x256xf32> to vector<1x1x256xf32>
    %70 = vector.broadcast %68 : vector<1x4x1xf32> to vector<1x4x256xf32>
    %71 = vector.broadcast %69 : vector<1x1x256xf32> to vector<1x4x256xf32>
    %72 = arith.mulf %70, %71 : vector<1x4x256xf32>
    %73 = arith.addf %66, %72 : vector<1x4x256xf32>
    %74 = vector.extract_strided_slice %59 {offsets = [0, 2], sizes = [4, 1], strides = [1, 1]} : vector<4x4xf32> to vector<4x1xf32>
    %75 = vector.shape_cast %74 : vector<4x1xf32> to vector<1x4x1xf32>
    %76 = vector.extract_strided_slice %16 {offsets = [0, 2, 0], sizes = [1, 1, 256], strides = [1, 1, 1]} : vector<1x4x256xf32> to vector<1x1x256xf32>
    %77 = vector.broadcast %75 : vector<1x4x1xf32> to vector<1x4x256xf32>
    %78 = vector.broadcast %76 : vector<1x1x256xf32> to vector<1x4x256xf32>
    %79 = arith.mulf %77, %78 : vector<1x4x256xf32>
    %80 = arith.addf %73, %79 : vector<1x4x256xf32>
    %81 = vector.extract_strided_slice %59 {offsets = [0, 3], sizes = [4, 1], strides = [1, 1]} : vector<4x4xf32> to vector<4x1xf32>
    %82 = vector.shape_cast %81 : vector<4x1xf32> to vector<1x4x1xf32>
    %83 = vector.extract_strided_slice %16 {offsets = [0, 3, 0], sizes = [1, 1, 256], strides = [1, 1, 1]} : vector<1x4x256xf32> to vector<1x1x256xf32>
    %84 = vector.broadcast %82 : vector<1x4x1xf32> to vector<1x4x256xf32>
    %85 = vector.broadcast %83 : vector<1x1x256xf32> to vector<1x4x256xf32>
    %86 = arith.mulf %84, %85 : vector<1x4x256xf32>
    %87 = arith.addf %80, %86 : vector<1x4x256xf32>
    %88 = vector.extract_strided_slice %16 {offsets = [0, 0, 16], sizes = [1, 4, 240], strides = [1, 1, 1]} : vector<1x4x256xf32> to vector<1x4x240xf32>
    %89 = vector.extract_strided_slice %16 {offsets = [0, 0, 0], sizes = [1, 4, 16], strides = [1, 1, 1]} : vector<1x4x256xf32> to vector<1x4x16xf32>
    %90 = tpu.concatenate %88, %89 in 2 : vector<1x4x240xf32>, vector<1x4x16xf32> -> vector<1x4x256xf32>
    %91 = vector.extract_strided_slice %16 {offsets = [0, 0, 240], sizes = [1, 4, 16], strides = [1, 1, 1]} : vector<1x4x256xf32> to vector<1x4x16xf32>
    %92 = vector.extract_strided_slice %16 {offsets = [0, 0, 0], sizes = [1, 4, 240], strides = [1, 1, 1]} : vector<1x4x256xf32> to vector<1x4x240xf32>
    %93 = tpu.concatenate %91, %92 in 2 : vector<1x4x16xf32>, vector<1x4x240xf32> -> vector<1x4x256xf32>
    %c15_i32 = arith.constant 15 : i32
    %94 = vector.broadcast %c15_i32 : i32 to vector<1x256xi32>
    %95 = arith.cmpi eq, %2, %94 : vector<1x256xi32>
    %96 = vector.shape_cast %95 : vector<1x256xi1> to vector<1x1x256xi1>
    %97 = vector.broadcast %96 : vector<1x1x256xi1> to vector<1x4x256xi1>
    %98 = arith.select %97, %93, %90 : vector<1x4x256xi1>, vector<1x4x256xf32>
    %99 = vector.extract_strided_slice %4 {offsets = [6, 0, 0], sizes = [1, 4, 4], strides = [1, 1, 1]} : vector<9x4x4xf32> to vector<1x4x4xf32>
    %100 = vector.shape_cast %99 : vector<1x4x4xf32> to vector<4x4xf32>
    %101 = vector.extract_strided_slice %100 {offsets = [0, 0], sizes = [4, 1], strides = [1, 1]} : vector<4x4xf32> to vector<4x1xf32>
    %102 = vector.shape_cast %101 : vector<4x1xf32> to vector<1x4x1xf32>
    %103 = vector.extract_strided_slice %98 {offsets = [0, 0, 0], sizes = [1, 1, 256], strides = [1, 1, 1]} : vector<1x4x256xf32> to vector<1x1x256xf32>
    %104 = vector.broadcast %102 : vector<1x4x1xf32> to vector<1x4x256xf32>
    %105 = vector.broadcast %103 : vector<1x1x256xf32> to vector<1x4x256xf32>
    %106 = arith.mulf %104, %105 : vector<1x4x256xf32>
    %107 = arith.addf %87, %106 : vector<1x4x256xf32>
    %108 = vector.extract_strided_slice %100 {offsets = [0, 1], sizes = [4, 1], strides = [1, 1]} : vector<4x4xf32> to vector<4x1xf32>
    %109 = vector.shape_cast %108 : vector<4x1xf32> to vector<1x4x1xf32>
    %110 = vector.extract_strided_slice %98 {offsets = [0, 1, 0], sizes = [1, 1, 256], strides = [1, 1, 1]} : vector<1x4x256xf32> to vector<1x1x256xf32>
    %111 = vector.broadcast %109 : vector<1x4x1xf32> to vector<1x4x256xf32>
    %112 = vector.broadcast %110 : vector<1x1x256xf32> to vector<1x4x256xf32>
    %113 = arith.mulf %111, %112 : vector<1x4x256xf32>
    %114 = arith.addf %107, %113 : vector<1x4x256xf32>
    %115 = vector.extract_strided_slice %100 {offsets = [0, 2], sizes = [4, 1], strides = [1, 1]} : vector<4x4xf32> to vector<4x1xf32>
    %116 = vector.shape_cast %115 : vector<4x1xf32> to vector<1x4x1xf32>
    %117 = vector.extract_strided_slice %98 {offsets = [0, 2, 0], sizes = [1, 1, 256], strides = [1, 1, 1]} : vector<1x4x256xf32> to vector<1x1x256xf32>
    %118 = vector.broadcast %116 : vector<1x4x1xf32> to vector<1x4x256xf32>
    %119 = vector.broadcast %117 : vector<1x1x256xf32> to vector<1x4x256xf32>
    %120 = arith.mulf %118, %119 : vector<1x4x256xf32>
    %121 = arith.addf %114, %120 : vector<1x4x256xf32>
    %122 = vector.extract_strided_slice %100 {offsets = [0, 3], sizes = [4, 1], strides = [1, 1]} : vector<4x4xf32> to vector<4x1xf32>
    %123 = vector.shape_cast %122 : vector<4x1xf32> to vector<1x4x1xf32>
    %124 = vector.extract_strided_slice %98 {offsets = [0, 3, 0], sizes = [1, 1, 256], strides = [1, 1, 1]} : vector<1x4x256xf32> to vector<1x1x256xf32>
    %125 = vector.broadcast %123 : vector<1x4x1xf32> to vector<1x4x256xf32>
    %126 = vector.broadcast %124 : vector<1x1x256xf32> to vector<1x4x256xf32>
    %127 = arith.mulf %125, %126 : vector<1x4x256xf32>
    %128 = arith.addf %121, %127 : vector<1x4x256xf32>
    %129 = vector.extract_strided_slice %0 {offsets = [0, 0, 240], sizes = [1, 4, 16], strides = [1, 1, 1]} : vector<1x4x256xf32> to vector<1x4x16xf32>
    %130 = vector.extract_strided_slice %0 {offsets = [0, 0, 0], sizes = [1, 4, 240], strides = [1, 1, 1]} : vector<1x4x256xf32> to vector<1x4x240xf32>
    %131 = tpu.concatenate %129, %130 in 2 : vector<1x4x16xf32>, vector<1x4x240xf32> -> vector<1x4x256xf32>
    %132 = vector.extract_strided_slice %0 {offsets = [0, 0, 16], sizes = [1, 4, 240], strides = [1, 1, 1]} : vector<1x4x256xf32> to vector<1x4x240xf32>
    %133 = vector.extract_strided_slice %0 {offsets = [0, 0, 0], sizes = [1, 4, 16], strides = [1, 1, 1]} : vector<1x4x256xf32> to vector<1x4x16xf32>
    %134 = tpu.concatenate %132, %133 in 2 : vector<1x4x240xf32>, vector<1x4x16xf32> -> vector<1x4x256xf32>
    %c0_i32_8 = arith.constant 0 : i32
    %135 = vector.broadcast %c0_i32_8 : i32 to vector<1x256xi32>
    %136 = arith.cmpi eq, %2, %135 : vector<1x256xi32>
    %137 = vector.shape_cast %136 : vector<1x256xi1> to vector<1x1x256xi1>
    %138 = vector.broadcast %137 : vector<1x1x256xi1> to vector<1x4x256xi1>
    %139 = arith.select %138, %134, %131 : vector<1x4x256xi1>, vector<1x4x256xf32>
    %140 = vector.extract_strided_slice %4 {offsets = [1, 0, 0], sizes = [1, 4, 4], strides = [1, 1, 1]} : vector<9x4x4xf32> to vector<1x4x4xf32>
    %141 = vector.shape_cast %140 : vector<1x4x4xf32> to vector<4x4xf32>
    %142 = vector.extract_strided_slice %141 {offsets = [0, 0], sizes = [4, 1], strides = [1, 1]} : vector<4x4xf32> to vector<4x1xf32>
    %143 = vector.shape_cast %142 : vector<4x1xf32> to vector<1x4x1xf32>
    %144 = vector.extract_strided_slice %139 {offsets = [0, 0, 0], sizes = [1, 1, 256], strides = [1, 1, 1]} : vector<1x4x256xf32> to vector<1x1x256xf32>
    %145 = vector.broadcast %143 : vector<1x4x1xf32> to vector<1x4x256xf32>
    %146 = vector.broadcast %144 : vector<1x1x256xf32> to vector<1x4x256xf32>
    %147 = arith.mulf %145, %146 : vector<1x4x256xf32>
    %148 = arith.addf %128, %147 : vector<1x4x256xf32>
    %149 = vector.extract_strided_slice %141 {offsets = [0, 1], sizes = [4, 1], strides = [1, 1]} : vector<4x4xf32> to vector<4x1xf32>
    %150 = vector.shape_cast %149 : vector<4x1xf32> to vector<1x4x1xf32>
    %151 = vector.extract_strided_slice %139 {offsets = [0, 1, 0], sizes = [1, 1, 256], strides = [1, 1, 1]} : vector<1x4x256xf32> to vector<1x1x256xf32>
    %152 = vector.broadcast %150 : vector<1x4x1xf32> to vector<1x4x256xf32>
    %153 = vector.broadcast %151 : vector<1x1x256xf32> to vector<1x4x256xf32>
    %154 = arith.mulf %152, %153 : vector<1x4x256xf32>
    %155 = arith.addf %148, %154 : vector<1x4x256xf32>
    %156 = vector.extract_strided_slice %141 {offsets = [0, 2], sizes = [4, 1], strides = [1, 1]} : vector<4x4xf32> to vector<4x1xf32>
    %157 = vector.shape_cast %156 : vector<4x1xf32> to vector<1x4x1xf32>
    %158 = vector.extract_strided_slice %139 {offsets = [0, 2, 0], sizes = [1, 1, 256], strides = [1, 1, 1]} : vector<1x4x256xf32> to vector<1x1x256xf32>
    %159 = vector.broadcast %157 : vector<1x4x1xf32> to vector<1x4x256xf32>
    %160 = vector.broadcast %158 : vector<1x1x256xf32> to vector<1x4x256xf32>
    %161 = arith.mulf %159, %160 : vector<1x4x256xf32>
    %162 = arith.addf %155, %161 : vector<1x4x256xf32>
    %163 = vector.extract_strided_slice %141 {offsets = [0, 3], sizes = [4, 1], strides = [1, 1]} : vector<4x4xf32> to vector<4x1xf32>
    %164 = vector.shape_cast %163 : vector<4x1xf32> to vector<1x4x1xf32>
    %165 = vector.extract_strided_slice %139 {offsets = [0, 3, 0], sizes = [1, 1, 256], strides = [1, 1, 1]} : vector<1x4x256xf32> to vector<1x1x256xf32>
    %166 = vector.broadcast %164 : vector<1x4x1xf32> to vector<1x4x256xf32>
    %167 = vector.broadcast %165 : vector<1x1x256xf32> to vector<1x4x256xf32>
    %168 = arith.mulf %166, %167 : vector<1x4x256xf32>
    %169 = arith.addf %162, %168 : vector<1x4x256xf32>
    %170 = vector.extract_strided_slice %4 {offsets = [4, 0, 0], sizes = [1, 4, 4], strides = [1, 1, 1]} : vector<9x4x4xf32> to vector<1x4x4xf32>
    %171 = vector.shape_cast %170 : vector<1x4x4xf32> to vector<4x4xf32>
    %172 = vector.extract_strided_slice %171 {offsets = [0, 0], sizes = [4, 1], strides = [1, 1]} : vector<4x4xf32> to vector<4x1xf32>
    %173 = vector.shape_cast %172 : vector<4x1xf32> to vector<1x4x1xf32>
    %174 = vector.extract_strided_slice %0 {offsets = [0, 0, 0], sizes = [1, 1, 256], strides = [1, 1, 1]} : vector<1x4x256xf32> to vector<1x1x256xf32>
    %175 = vector.broadcast %173 : vector<1x4x1xf32> to vector<1x4x256xf32>
    %176 = vector.broadcast %174 : vector<1x1x256xf32> to vector<1x4x256xf32>
    %177 = arith.mulf %175, %176 : vector<1x4x256xf32>
    %178 = arith.addf %169, %177 : vector<1x4x256xf32>
    %179 = vector.extract_strided_slice %171 {offsets = [0, 1], sizes = [4, 1], strides = [1, 1]} : vector<4x4xf32> to vector<4x1xf32>
    %180 = vector.shape_cast %179 : vector<4x1xf32> to vector<1x4x1xf32>
    %181 = vector.extract_strided_slice %0 {offsets = [0, 1, 0], sizes = [1, 1, 256], strides = [1, 1, 1]} : vector<1x4x256xf32> to vector<1x1x256xf32>
    %182 = vector.broadcast %180 : vector<1x4x1xf32> to vector<1x4x256xf32>
    %183 = vector.broadcast %181 : vector<1x1x256xf32> to vector<1x4x256xf32>
    %184 = arith.mulf %182, %183 : vector<1x4x256xf32>
    %185 = arith.addf %178, %184 : vector<1x4x256xf32>
    %186 = vector.extract_strided_slice %171 {offsets = [0, 2], sizes = [4, 1], strides = [1, 1]} : vector<4x4xf32> to vector<4x1xf32>
    %187 = vector.shape_cast %186 : vector<4x1xf32> to vector<1x4x1xf32>
    %188 = vector.extract_strided_slice %0 {offsets = [0, 2, 0], sizes = [1, 1, 256], strides = [1, 1, 1]} : vector<1x4x256xf32> to vector<1x1x256xf32>
    %189 = vector.broadcast %187 : vector<1x4x1xf32> to vector<1x4x256xf32>
    %190 = vector.broadcast %188 : vector<1x1x256xf32> to vector<1x4x256xf32>
    %191 = arith.mulf %189, %190 : vector<1x4x256xf32>
    %192 = arith.addf %185, %191 : vector<1x4x256xf32>
    %193 = vector.extract_strided_slice %171 {offsets = [0, 3], sizes = [4, 1], strides = [1, 1]} : vector<4x4xf32> to vector<4x1xf32>
    %194 = vector.shape_cast %193 : vector<4x1xf32> to vector<1x4x1xf32>
    %195 = vector.extract_strided_slice %0 {offsets = [0, 3, 0], sizes = [1, 1, 256], strides = [1, 1, 1]} : vector<1x4x256xf32> to vector<1x1x256xf32>
    %196 = vector.broadcast %194 : vector<1x4x1xf32> to vector<1x4x256xf32>
    %197 = vector.broadcast %195 : vector<1x1x256xf32> to vector<1x4x256xf32>
    %198 = arith.mulf %196, %197 : vector<1x4x256xf32>
    %199 = arith.addf %192, %198 : vector<1x4x256xf32>
    %200 = vector.extract_strided_slice %0 {offsets = [0, 0, 16], sizes = [1, 4, 240], strides = [1, 1, 1]} : vector<1x4x256xf32> to vector<1x4x240xf32>
    %201 = vector.extract_strided_slice %0 {offsets = [0, 0, 0], sizes = [1, 4, 16], strides = [1, 1, 1]} : vector<1x4x256xf32> to vector<1x4x16xf32>
    %202 = tpu.concatenate %200, %201 in 2 : vector<1x4x240xf32>, vector<1x4x16xf32> -> vector<1x4x256xf32>
    %203 = vector.extract_strided_slice %0 {offsets = [0, 0, 240], sizes = [1, 4, 16], strides = [1, 1, 1]} : vector<1x4x256xf32> to vector<1x4x16xf32>
    %204 = vector.extract_strided_slice %0 {offsets = [0, 0, 0], sizes = [1, 4, 240], strides = [1, 1, 1]} : vector<1x4x256xf32> to vector<1x4x240xf32>
    %205 = tpu.concatenate %203, %204 in 2 : vector<1x4x16xf32>, vector<1x4x240xf32> -> vector<1x4x256xf32>
    %c15_i32_9 = arith.constant 15 : i32
    %206 = vector.broadcast %c15_i32_9 : i32 to vector<1x256xi32>
    %207 = arith.cmpi eq, %2, %206 : vector<1x256xi32>
    %208 = vector.shape_cast %207 : vector<1x256xi1> to vector<1x1x256xi1>
    %209 = vector.broadcast %208 : vector<1x1x256xi1> to vector<1x4x256xi1>
    %210 = arith.select %209, %205, %202 : vector<1x4x256xi1>, vector<1x4x256xf32>
    %211 = vector.extract_strided_slice %4 {offsets = [7, 0, 0], sizes = [1, 4, 4], strides = [1, 1, 1]} : vector<9x4x4xf32> to vector<1x4x4xf32>
    %212 = vector.shape_cast %211 : vector<1x4x4xf32> to vector<4x4xf32>
    %213 = vector.extract_strided_slice %212 {offsets = [0, 0], sizes = [4, 1], strides = [1, 1]} : vector<4x4xf32> to vector<4x1xf32>
    %214 = vector.shape_cast %213 : vector<4x1xf32> to vector<1x4x1xf32>
    %215 = vector.extract_strided_slice %210 {offsets = [0, 0, 0], sizes = [1, 1, 256], strides = [1, 1, 1]} : vector<1x4x256xf32> to vector<1x1x256xf32>
    %216 = vector.broadcast %214 : vector<1x4x1xf32> to vector<1x4x256xf32>
    %217 = vector.broadcast %215 : vector<1x1x256xf32> to vector<1x4x256xf32>
    %218 = arith.mulf %216, %217 : vector<1x4x256xf32>
    %219 = arith.addf %199, %218 : vector<1x4x256xf32>
    %220 = vector.extract_strided_slice %212 {offsets = [0, 1], sizes = [4, 1], strides = [1, 1]} : vector<4x4xf32> to vector<4x1xf32>
    %221 = vector.shape_cast %220 : vector<4x1xf32> to vector<1x4x1xf32>
    %222 = vector.extract_strided_slice %210 {offsets = [0, 1, 0], sizes = [1, 1, 256], strides = [1, 1, 1]} : vector<1x4x256xf32> to vector<1x1x256xf32>
    %223 = vector.broadcast %221 : vector<1x4x1xf32> to vector<1x4x256xf32>
    %224 = vector.broadcast %222 : vector<1x1x256xf32> to vector<1x4x256xf32>
    %225 = arith.mulf %223, %224 : vector<1x4x256xf32>
    %226 = arith.addf %219, %225 : vector<1x4x256xf32>
    %227 = vector.extract_strided_slice %212 {offsets = [0, 2], sizes = [4, 1], strides = [1, 1]} : vector<4x4xf32> to vector<4x1xf32>
    %228 = vector.shape_cast %227 : vector<4x1xf32> to vector<1x4x1xf32>
    %229 = vector.extract_strided_slice %210 {offsets = [0, 2, 0], sizes = [1, 1, 256], strides = [1, 1, 1]} : vector<1x4x256xf32> to vector<1x1x256xf32>
    %230 = vector.broadcast %228 : vector<1x4x1xf32> to vector<1x4x256xf32>
    %231 = vector.broadcast %229 : vector<1x1x256xf32> to vector<1x4x256xf32>
    %232 = arith.mulf %230, %231 : vector<1x4x256xf32>
    %233 = arith.addf %226, %232 : vector<1x4x256xf32>
    %234 = vector.extract_strided_slice %212 {offsets = [0, 3], sizes = [4, 1], strides = [1, 1]} : vector<4x4xf32> to vector<4x1xf32>
    %235 = vector.shape_cast %234 : vector<4x1xf32> to vector<1x4x1xf32>
    %236 = vector.extract_strided_slice %210 {offsets = [0, 3, 0], sizes = [1, 1, 256], strides = [1, 1, 1]} : vector<1x4x256xf32> to vector<1x1x256xf32>
    %237 = vector.broadcast %235 : vector<1x4x1xf32> to vector<1x4x256xf32>
    %238 = vector.broadcast %236 : vector<1x1x256xf32> to vector<1x4x256xf32>
    %239 = arith.mulf %237, %238 : vector<1x4x256xf32>
    %240 = arith.addf %233, %239 : vector<1x4x256xf32>
    %241 = vector.extract_strided_slice %0 {offsets = [0, 0, 1], sizes = [1, 4, 255], strides = [1, 1, 1]} : vector<1x4x256xf32> to vector<1x4x255xf32>
    %242 = vector.extract_strided_slice %0 {offsets = [0, 0, 0], sizes = [1, 4, 1], strides = [1, 1, 1]} : vector<1x4x256xf32> to vector<1x4x1xf32>
    %243 = tpu.concatenate %241, %242 in 2 : vector<1x4x255xf32>, vector<1x4x1xf32> -> vector<1x4x256xf32>
    %244 = vector.extract_strided_slice %0 {offsets = [0, 0, 255], sizes = [1, 4, 1], strides = [1, 1, 1]} : vector<1x4x256xf32> to vector<1x4x1xf32>
    %245 = vector.extract_strided_slice %0 {offsets = [0, 0, 0], sizes = [1, 4, 255], strides = [1, 1, 1]} : vector<1x4x256xf32> to vector<1x4x255xf32>
    %246 = tpu.concatenate %244, %245 in 2 : vector<1x4x1xf32>, vector<1x4x255xf32> -> vector<1x4x256xf32>
    %c15_i32_10 = arith.constant 15 : i32
    %247 = vector.broadcast %c15_i32_10 : i32 to vector<1x256xi32>
    %248 = arith.cmpi eq, %3, %247 : vector<1x256xi32>
    %249 = vector.shape_cast %248 : vector<1x256xi1> to vector<1x1x256xi1>
    %250 = vector.broadcast %249 : vector<1x1x256xi1> to vector<1x4x256xi1>
    %251 = arith.select %250, %246, %243 : vector<1x4x256xi1>, vector<1x4x256xf32>
    %252 = vector.extract_strided_slice %251 {offsets = [0, 0, 240], sizes = [1, 4, 16], strides = [1, 1, 1]} : vector<1x4x256xf32> to vector<1x4x16xf32>
    %253 = vector.extract_strided_slice %251 {offsets = [0, 0, 0], sizes = [1, 4, 240], strides = [1, 1, 1]} : vector<1x4x256xf32> to vector<1x4x240xf32>
    %254 = tpu.concatenate %252, %253 in 2 : vector<1x4x16xf32>, vector<1x4x240xf32> -> vector<1x4x256xf32>
    %255 = vector.extract_strided_slice %251 {offsets = [0, 0, 16], sizes = [1, 4, 240], strides = [1, 1, 1]} : vector<1x4x256xf32> to vector<1x4x240xf32>
    %256 = vector.extract_strided_slice %251 {offsets = [0, 0, 0], sizes = [1, 4, 16], strides = [1, 1, 1]} : vector<1x4x256xf32> to vector<1x4x16xf32>
    %257 = tpu.concatenate %255, %256 in 2 : vector<1x4x240xf32>, vector<1x4x16xf32> -> vector<1x4x256xf32>
    %c0_i32_11 = arith.constant 0 : i32
    %258 = vector.broadcast %c0_i32_11 : i32 to vector<1x256xi32>
    %259 = arith.cmpi eq, %2, %258 : vector<1x256xi32>
    %260 = vector.shape_cast %259 : vector<1x256xi1> to vector<1x1x256xi1>
    %261 = vector.broadcast %260 : vector<1x1x256xi1> to vector<1x4x256xi1>
    %262 = arith.select %261, %257, %254 : vector<1x4x256xi1>, vector<1x4x256xf32>
    %263 = vector.extract_strided_slice %4 {offsets = [2, 0, 0], sizes = [1, 4, 4], strides = [1, 1, 1]} : vector<9x4x4xf32> to vector<1x4x4xf32>
    %264 = vector.shape_cast %263 : vector<1x4x4xf32> to vector<4x4xf32>
    %265 = vector.extract_strided_slice %264 {offsets = [0, 0], sizes = [4, 1], strides = [1, 1]} : vector<4x4xf32> to vector<4x1xf32>
    %266 = vector.shape_cast %265 : vector<4x1xf32> to vector<1x4x1xf32>
    %267 = vector.extract_strided_slice %262 {offsets = [0, 0, 0], sizes = [1, 1, 256], strides = [1, 1, 1]} : vector<1x4x256xf32> to vector<1x1x256xf32>
    %268 = vector.broadcast %266 : vector<1x4x1xf32> to vector<1x4x256xf32>
    %269 = vector.broadcast %267 : vector<1x1x256xf32> to vector<1x4x256xf32>
    %270 = arith.mulf %268, %269 : vector<1x4x256xf32>
    %271 = arith.addf %240, %270 : vector<1x4x256xf32>
    %272 = vector.extract_strided_slice %264 {offsets = [0, 1], sizes = [4, 1], strides = [1, 1]} : vector<4x4xf32> to vector<4x1xf32>
    %273 = vector.shape_cast %272 : vector<4x1xf32> to vector<1x4x1xf32>
    %274 = vector.extract_strided_slice %262 {offsets = [0, 1, 0], sizes = [1, 1, 256], strides = [1, 1, 1]} : vector<1x4x256xf32> to vector<1x1x256xf32>
    %275 = vector.broadcast %273 : vector<1x4x1xf32> to vector<1x4x256xf32>
    %276 = vector.broadcast %274 : vector<1x1x256xf32> to vector<1x4x256xf32>
    %277 = arith.mulf %275, %276 : vector<1x4x256xf32>
    %278 = arith.addf %271, %277 : vector<1x4x256xf32>
    %279 = vector.extract_strided_slice %264 {offsets = [0, 2], sizes = [4, 1], strides = [1, 1]} : vector<4x4xf32> to vector<4x1xf32>
    %280 = vector.shape_cast %279 : vector<4x1xf32> to vector<1x4x1xf32>
    %281 = vector.extract_strided_slice %262 {offsets = [0, 2, 0], sizes = [1, 1, 256], strides = [1, 1, 1]} : vector<1x4x256xf32> to vector<1x1x256xf32>
    %282 = vector.broadcast %280 : vector<1x4x1xf32> to vector<1x4x256xf32>
    %283 = vector.broadcast %281 : vector<1x1x256xf32> to vector<1x4x256xf32>
    %284 = arith.mulf %282, %283 : vector<1x4x256xf32>
    %285 = arith.addf %278, %284 : vector<1x4x256xf32>
    %286 = vector.extract_strided_slice %264 {offsets = [0, 3], sizes = [4, 1], strides = [1, 1]} : vector<4x4xf32> to vector<4x1xf32>
    %287 = vector.shape_cast %286 : vector<4x1xf32> to vector<1x4x1xf32>
    %288 = vector.extract_strided_slice %262 {offsets = [0, 3, 0], sizes = [1, 1, 256], strides = [1, 1, 1]} : vector<1x4x256xf32> to vector<1x1x256xf32>
    %289 = vector.broadcast %287 : vector<1x4x1xf32> to vector<1x4x256xf32>
    %290 = vector.broadcast %288 : vector<1x1x256xf32> to vector<1x4x256xf32>
    %291 = arith.mulf %289, %290 : vector<1x4x256xf32>
    %292 = arith.addf %285, %291 : vector<1x4x256xf32>
    %293 = vector.extract_strided_slice %4 {offsets = [5, 0, 0], sizes = [1, 4, 4], strides = [1, 1, 1]} : vector<9x4x4xf32> to vector<1x4x4xf32>
    %294 = vector.shape_cast %293 : vector<1x4x4xf32> to vector<4x4xf32>
    %295 = vector.extract_strided_slice %294 {offsets = [0, 0], sizes = [4, 1], strides = [1, 1]} : vector<4x4xf32> to vector<4x1xf32>
    %296 = vector.shape_cast %295 : vector<4x1xf32> to vector<1x4x1xf32>
    %297 = vector.extract_strided_slice %251 {offsets = [0, 0, 0], sizes = [1, 1, 256], strides = [1, 1, 1]} : vector<1x4x256xf32> to vector<1x1x256xf32>
    %298 = vector.broadcast %296 : vector<1x4x1xf32> to vector<1x4x256xf32>
    %299 = vector.broadcast %297 : vector<1x1x256xf32> to vector<1x4x256xf32>
    %300 = arith.mulf %298, %299 : vector<1x4x256xf32>
    %301 = arith.addf %292, %300 : vector<1x4x256xf32>
    %302 = vector.extract_strided_slice %294 {offsets = [0, 1], sizes = [4, 1], strides = [1, 1]} : vector<4x4xf32> to vector<4x1xf32>
    %303 = vector.shape_cast %302 : vector<4x1xf32> to vector<1x4x1xf32>
    %304 = vector.extract_strided_slice %251 {offsets = [0, 1, 0], sizes = [1, 1, 256], strides = [1, 1, 1]} : vector<1x4x256xf32> to vector<1x1x256xf32>
    %305 = vector.broadcast %303 : vector<1x4x1xf32> to vector<1x4x256xf32>
    %306 = vector.broadcast %304 : vector<1x1x256xf32> to vector<1x4x256xf32>
    %307 = arith.mulf %305, %306 : vector<1x4x256xf32>
    %308 = arith.addf %301, %307 : vector<1x4x256xf32>
    %309 = vector.extract_strided_slice %294 {offsets = [0, 2], sizes = [4, 1], strides = [1, 1]} : vector<4x4xf32> to vector<4x1xf32>
    %310 = vector.shape_cast %309 : vector<4x1xf32> to vector<1x4x1xf32>
    %311 = vector.extract_strided_slice %251 {offsets = [0, 2, 0], sizes = [1, 1, 256], strides = [1, 1, 1]} : vector<1x4x256xf32> to vector<1x1x256xf32>
    %312 = vector.broadcast %310 : vector<1x4x1xf32> to vector<1x4x256xf32>
    %313 = vector.broadcast %311 : vector<1x1x256xf32> to vector<1x4x256xf32>
    %314 = arith.mulf %312, %313 : vector<1x4x256xf32>
    %315 = arith.addf %308, %314 : vector<1x4x256xf32>
    %316 = vector.extract_strided_slice %294 {offsets = [0, 3], sizes = [4, 1], strides = [1, 1]} : vector<4x4xf32> to vector<4x1xf32>
    %317 = vector.shape_cast %316 : vector<4x1xf32> to vector<1x4x1xf32>
    %318 = vector.extract_strided_slice %251 {offsets = [0, 3, 0], sizes = [1, 1, 256], strides = [1, 1, 1]} : vector<1x4x256xf32> to vector<1x1x256xf32>
    %319 = vector.broadcast %317 : vector<1x4x1xf32> to vector<1x4x256xf32>
    %320 = vector.broadcast %318 : vector<1x1x256xf32> to vector<1x4x256xf32>
    %321 = arith.mulf %319, %320 : vector<1x4x256xf32>
    %322 = arith.addf %315, %321 : vector<1x4x256xf32>
    %323 = vector.extract_strided_slice %251 {offsets = [0, 0, 16], sizes = [1, 4, 240], strides = [1, 1, 1]} : vector<1x4x256xf32> to vector<1x4x240xf32>
    %324 = vector.extract_strided_slice %251 {offsets = [0, 0, 0], sizes = [1, 4, 16], strides = [1, 1, 1]} : vector<1x4x256xf32> to vector<1x4x16xf32>
    %325 = tpu.concatenate %323, %324 in 2 : vector<1x4x240xf32>, vector<1x4x16xf32> -> vector<1x4x256xf32>
    %326 = vector.extract_strided_slice %251 {offsets = [0, 0, 240], sizes = [1, 4, 16], strides = [1, 1, 1]} : vector<1x4x256xf32> to vector<1x4x16xf32>
    %327 = vector.extract_strided_slice %251 {offsets = [0, 0, 0], sizes = [1, 4, 240], strides = [1, 1, 1]} : vector<1x4x256xf32> to vector<1x4x240xf32>
    %328 = tpu.concatenate %326, %327 in 2 : vector<1x4x16xf32>, vector<1x4x240xf32> -> vector<1x4x256xf32>
    %c15_i32_12 = arith.constant 15 : i32
    %329 = vector.broadcast %c15_i32_12 : i32 to vector<1x256xi32>
    %330 = arith.cmpi eq, %2, %329 : vector<1x256xi32>
    %331 = vector.shape_cast %330 : vector<1x256xi1> to vector<1x1x256xi1>
    %332 = vector.broadcast %331 : vector<1x1x256xi1> to vector<1x4x256xi1>
    %333 = arith.select %332, %328, %325 : vector<1x4x256xi1>, vector<1x4x256xf32>
    %334 = vector.extract_strided_slice %4 {offsets = [8, 0, 0], sizes = [1, 4, 4], strides = [1, 1, 1]} : vector<9x4x4xf32> to vector<1x4x4xf32>
    %335 = vector.shape_cast %334 : vector<1x4x4xf32> to vector<4x4xf32>
    %336 = vector.extract_strided_slice %335 {offsets = [0, 0], sizes = [4, 1], strides = [1, 1]} : vector<4x4xf32> to vector<4x1xf32>
    %337 = vector.shape_cast %336 : vector<4x1xf32> to vector<1x4x1xf32>
    %338 = vector.extract_strided_slice %333 {offsets = [0, 0, 0], sizes = [1, 1, 256], strides = [1, 1, 1]} : vector<1x4x256xf32> to vector<1x1x256xf32>
    %339 = vector.broadcast %337 : vector<1x4x1xf32> to vector<1x4x256xf32>
    %340 = vector.broadcast %338 : vector<1x1x256xf32> to vector<1x4x256xf32>
    %341 = arith.mulf %339, %340 : vector<1x4x256xf32>
    %342 = arith.addf %322, %341 : vector<1x4x256xf32>
    %343 = vector.extract_strided_slice %335 {offsets = [0, 1], sizes = [4, 1], strides = [1, 1]} : vector<4x4xf32> to vector<4x1xf32>
    %344 = vector.shape_cast %343 : vector<4x1xf32> to vector<1x4x1xf32>
    %345 = vector.extract_strided_slice %333 {offsets = [0, 1, 0], sizes = [1, 1, 256], strides = [1, 1, 1]} : vector<1x4x256xf32> to vector<1x1x256xf32>
    %346 = vector.broadcast %344 : vector<1x4x1xf32> to vector<1x4x256xf32>
    %347 = vector.broadcast %345 : vector<1x1x256xf32> to vector<1x4x256xf32>
    %348 = arith.mulf %346, %347 : vector<1x4x256xf32>
    %349 = arith.addf %342, %348 : vector<1x4x256xf32>
    %350 = vector.extract_strided_slice %335 {offsets = [0, 2], sizes = [4, 1], strides = [1, 1]} : vector<4x4xf32> to vector<4x1xf32>
    %351 = vector.shape_cast %350 : vector<4x1xf32> to vector<1x4x1xf32>
    %352 = vector.extract_strided_slice %333 {offsets = [0, 2, 0], sizes = [1, 1, 256], strides = [1, 1, 1]} : vector<1x4x256xf32> to vector<1x1x256xf32>
    %353 = vector.broadcast %351 : vector<1x4x1xf32> to vector<1x4x256xf32>
    %354 = vector.broadcast %352 : vector<1x1x256xf32> to vector<1x4x256xf32>
    %355 = arith.mulf %353, %354 : vector<1x4x256xf32>
    %356 = arith.addf %349, %355 : vector<1x4x256xf32>
    %357 = vector.extract_strided_slice %335 {offsets = [0, 3], sizes = [4, 1], strides = [1, 1]} : vector<4x4xf32> to vector<4x1xf32>
    %358 = vector.shape_cast %357 : vector<4x1xf32> to vector<1x4x1xf32>
    %359 = vector.extract_strided_slice %333 {offsets = [0, 3, 0], sizes = [1, 1, 256], strides = [1, 1, 1]} : vector<1x4x256xf32> to vector<1x1x256xf32>
    %360 = vector.broadcast %358 : vector<1x4x1xf32> to vector<1x4x256xf32>
    %361 = vector.broadcast %359 : vector<1x1x256xf32> to vector<1x4x256xf32>
    %362 = arith.mulf %360, %361 : vector<1x4x256xf32>
    %363 = arith.addf %356, %362 : vector<1x4x256xf32>
    %cst_13 = arith.constant dense<0.000000e+00> : vector<1x4xf32>
    %364 = vector.multi_reduction <add>, %363, %cst_13 [2] : vector<1x4x256xf32> to vector<1x4xf32>
    %365 = vector.shape_cast %364 : vector<1x4xf32> to vector<1x4x1xf32>
    %cst_14 = arith.constant 3.906250e-03 : f32
    %366 = vector.broadcast %cst_14 : f32 to vector<1x4x1xf32>
    %367 = arith.mulf %365, %366 : vector<1x4x1xf32>
    %368 = vector.broadcast %367 : vector<1x4x1xf32> to vector<1x4x256xf32>
    %369 = arith.subf %363, %368 : vector<1x4x256xf32>
    %370 = arith.mulf %369, %369 : vector<1x4x256xf32>
    %cst_15 = arith.constant dense<0.000000e+00> : vector<1x4xf32>
    %371 = vector.multi_reduction <add>, %370, %cst_15 [2] : vector<1x4x256xf32> to vector<1x4xf32>
    %372 = vector.shape_cast %371 : vector<1x4xf32> to vector<1x4x1xf32>
    %cst_16 = arith.constant 3.906250e-03 : f32
    %373 = vector.broadcast %cst_16 : f32 to vector<1x4x1xf32>
    %374 = arith.mulf %372, %373 : vector<1x4x1xf32>
    %cst_17 = arith.constant 9.99999974E-6 : f32
    %375 = vector.broadcast %cst_17 : f32 to vector<1x4x1xf32>
    %376 = arith.addf %374, %375 : vector<1x4x1xf32>
    %377 = math.rsqrt %376 : vector<1x4x1xf32>
    %378 = vector.broadcast %377 : vector<1x4x1xf32> to vector<1x4x256xf32>
    %379 = arith.mulf %369, %378 : vector<1x4x256xf32>
    %cst_18 = arith.constant 1.000000e-01 : f32
    %380 = vector.broadcast %cst_18 : f32 to vector<1x4x256xf32>
    %381 = arith.mulf %380, %379 : vector<1x4x256xf32>
    %382 = arith.maximumf %379, %381 : vector<1x4x256xf32>
    %c0_19 = arith.constant 0 : index
    %c0_20 = arith.constant 0 : index
    %c0_21 = arith.constant 0 : index
    %383 = vector.load %arg3[%c0_19, %c0_20, %c0_21] : memref<9x4x4xf32, #tpu.memory_space<vmem>>, vector<9x4x4xf32>
    %cst_22 = arith.constant 0.000000e+00 : f32
    %384 = vector.broadcast %cst_22 : f32 to vector<1x4x256xf32>
    %385 = vector.extract_strided_slice %382 {offsets = [0, 0, 255], sizes = [1, 4, 1], strides = [1, 1, 1]} : vector<1x4x256xf32> to vector<1x4x1xf32>
    %386 = vector.extract_strided_slice %382 {offsets = [0, 0, 0], sizes = [1, 4, 255], strides = [1, 1, 1]} : vector<1x4x256xf32> to vector<1x4x255xf32>
    %387 = tpu.concatenate %385, %386 in 2 : vector<1x4x1xf32>, vector<1x4x255xf32> -> vector<1x4x256xf32>
    %388 = vector.extract_strided_slice %382 {offsets = [0, 0, 1], sizes = [1, 4, 255], strides = [1, 1, 1]} : vector<1x4x256xf32> to vector<1x4x255xf32>
    %389 = vector.extract_strided_slice %382 {offsets = [0, 0, 0], sizes = [1, 4, 1], strides = [1, 1, 1]} : vector<1x4x256xf32> to vector<1x4x1xf32>
    %390 = tpu.concatenate %388, %389 in 2 : vector<1x4x255xf32>, vector<1x4x1xf32> -> vector<1x4x256xf32>
    %c0_i32_23 = arith.constant 0 : i32
    %391 = vector.broadcast %c0_i32_23 : i32 to vector<1x256xi32>
    %392 = arith.cmpi eq, %3, %391 : vector<1x256xi32>
    %393 = vector.shape_cast %392 : vector<1x256xi1> to vector<1x1x256xi1>
    %394 = vector.broadcast %393 : vector<1x1x256xi1> to vector<1x4x256xi1>
    %395 = arith.select %394, %390, %387 : vector<1x4x256xi1>, vector<1x4x256xf32>
    %396 = vector.extract_strided_slice %395 {offsets = [0, 0, 240], sizes = [1, 4, 16], strides = [1, 1, 1]} : vector<1x4x256xf32> to vector<1x4x16xf32>
    %397 = vector.extract_strided_slice %395 {offsets = [0, 0, 0], sizes = [1, 4, 240], strides = [1, 1, 1]} : vector<1x4x256xf32> to vector<1x4x240xf32>
    %398 = tpu.concatenate %396, %397 in 2 : vector<1x4x16xf32>, vector<1x4x240xf32> -> vector<1x4x256xf32>
    %399 = vector.extract_strided_slice %395 {offsets = [0, 0, 16], sizes = [1, 4, 240], strides = [1, 1, 1]} : vector<1x4x256xf32> to vector<1x4x240xf32>
    %400 = vector.extract_strided_slice %395 {offsets = [0, 0, 0], sizes = [1, 4, 16], strides = [1, 1, 1]} : vector<1x4x256xf32> to vector<1x4x16xf32>
    %401 = tpu.concatenate %399, %400 in 2 : vector<1x4x240xf32>, vector<1x4x16xf32> -> vector<1x4x256xf32>
    %c0_i32_24 = arith.constant 0 : i32
    %402 = vector.broadcast %c0_i32_24 : i32 to vector<1x256xi32>
    %403 = arith.cmpi eq, %2, %402 : vector<1x256xi32>
    %404 = vector.shape_cast %403 : vector<1x256xi1> to vector<1x1x256xi1>
    %405 = vector.broadcast %404 : vector<1x1x256xi1> to vector<1x4x256xi1>
    %406 = arith.select %405, %401, %398 : vector<1x4x256xi1>, vector<1x4x256xf32>
    %407 = vector.extract_strided_slice %383 {offsets = [0, 0, 0], sizes = [1, 4, 4], strides = [1, 1, 1]} : vector<9x4x4xf32> to vector<1x4x4xf32>
    %408 = vector.shape_cast %407 : vector<1x4x4xf32> to vector<4x4xf32>
    %409 = vector.extract_strided_slice %408 {offsets = [0, 0], sizes = [4, 1], strides = [1, 1]} : vector<4x4xf32> to vector<4x1xf32>
    %410 = vector.shape_cast %409 : vector<4x1xf32> to vector<1x4x1xf32>
    %411 = vector.extract_strided_slice %406 {offsets = [0, 0, 0], sizes = [1, 1, 256], strides = [1, 1, 1]} : vector<1x4x256xf32> to vector<1x1x256xf32>
    %412 = vector.broadcast %410 : vector<1x4x1xf32> to vector<1x4x256xf32>
    %413 = vector.broadcast %411 : vector<1x1x256xf32> to vector<1x4x256xf32>
    %414 = arith.mulf %412, %413 : vector<1x4x256xf32>
    %415 = arith.addf %384, %414 : vector<1x4x256xf32>
    %416 = vector.extract_strided_slice %408 {offsets = [0, 1], sizes = [4, 1], strides = [1, 1]} : vector<4x4xf32> to vector<4x1xf32>
    %417 = vector.shape_cast %416 : vector<4x1xf32> to vector<1x4x1xf32>
    %418 = vector.extract_strided_slice %406 {offsets = [0, 1, 0], sizes = [1, 1, 256], strides = [1, 1, 1]} : vector<1x4x256xf32> to vector<1x1x256xf32>
    %419 = vector.broadcast %417 : vector<1x4x1xf32> to vector<1x4x256xf32>
    %420 = vector.broadcast %418 : vector<1x1x256xf32> to vector<1x4x256xf32>
    %421 = arith.mulf %419, %420 : vector<1x4x256xf32>
    %422 = arith.addf %415, %421 : vector<1x4x256xf32>
    %423 = vector.extract_strided_slice %408 {offsets = [0, 2], sizes = [4, 1], strides = [1, 1]} : vector<4x4xf32> to vector<4x1xf32>
    %424 = vector.shape_cast %423 : vector<4x1xf32> to vector<1x4x1xf32>
    %425 = vector.extract_strided_slice %406 {offsets = [0, 2, 0], sizes = [1, 1, 256], strides = [1, 1, 1]} : vector<1x4x256xf32> to vector<1x1x256xf32>
    %426 = vector.broadcast %424 : vector<1x4x1xf32> to vector<1x4x256xf32>
    %427 = vector.broadcast %425 : vector<1x1x256xf32> to vector<1x4x256xf32>
    %428 = arith.mulf %426, %427 : vector<1x4x256xf32>
    %429 = arith.addf %422, %428 : vector<1x4x256xf32>
    %430 = vector.extract_strided_slice %408 {offsets = [0, 3], sizes = [4, 1], strides = [1, 1]} : vector<4x4xf32> to vector<4x1xf32>
    %431 = vector.shape_cast %430 : vector<4x1xf32> to vector<1x4x1xf32>
    %432 = vector.extract_strided_slice %406 {offsets = [0, 3, 0], sizes = [1, 1, 256], strides = [1, 1, 1]} : vector<1x4x256xf32> to vector<1x1x256xf32>
    %433 = vector.broadcast %431 : vector<1x4x1xf32> to vector<1x4x256xf32>
    %434 = vector.broadcast %432 : vector<1x1x256xf32> to vector<1x4x256xf32>
    %435 = arith.mulf %433, %434 : vector<1x4x256xf32>
    %436 = arith.addf %429, %435 : vector<1x4x256xf32>
    %437 = vector.extract_strided_slice %383 {offsets = [3, 0, 0], sizes = [1, 4, 4], strides = [1, 1, 1]} : vector<9x4x4xf32> to vector<1x4x4xf32>
    %438 = vector.shape_cast %437 : vector<1x4x4xf32> to vector<4x4xf32>
    %439 = vector.extract_strided_slice %438 {offsets = [0, 0], sizes = [4, 1], strides = [1, 1]} : vector<4x4xf32> to vector<4x1xf32>
    %440 = vector.shape_cast %439 : vector<4x1xf32> to vector<1x4x1xf32>
    %441 = vector.extract_strided_slice %395 {offsets = [0, 0, 0], sizes = [1, 1, 256], strides = [1, 1, 1]} : vector<1x4x256xf32> to vector<1x1x256xf32>
    %442 = vector.broadcast %440 : vector<1x4x1xf32> to vector<1x4x256xf32>
    %443 = vector.broadcast %441 : vector<1x1x256xf32> to vector<1x4x256xf32>
    %444 = arith.mulf %442, %443 : vector<1x4x256xf32>
    %445 = arith.addf %436, %444 : vector<1x4x256xf32>
    %446 = vector.extract_strided_slice %438 {offsets = [0, 1], sizes = [4, 1], strides = [1, 1]} : vector<4x4xf32> to vector<4x1xf32>
    %447 = vector.shape_cast %446 : vector<4x1xf32> to vector<1x4x1xf32>
    %448 = vector.extract_strided_slice %395 {offsets = [0, 1, 0], sizes = [1, 1, 256], strides = [1, 1, 1]} : vector<1x4x256xf32> to vector<1x1x256xf32>
    %449 = vector.broadcast %447 : vector<1x4x1xf32> to vector<1x4x256xf32>
    %450 = vector.broadcast %448 : vector<1x1x256xf32> to vector<1x4x256xf32>
    %451 = arith.mulf %449, %450 : vector<1x4x256xf32>
    %452 = arith.addf %445, %451 : vector<1x4x256xf32>
    %453 = vector.extract_strided_slice %438 {offsets = [0, 2], sizes = [4, 1], strides = [1, 1]} : vector<4x4xf32> to vector<4x1xf32>
    %454 = vector.shape_cast %453 : vector<4x1xf32> to vector<1x4x1xf32>
    %455 = vector.extract_strided_slice %395 {offsets = [0, 2, 0], sizes = [1, 1, 256], strides = [1, 1, 1]} : vector<1x4x256xf32> to vector<1x1x256xf32>
    %456 = vector.broadcast %454 : vector<1x4x1xf32> to vector<1x4x256xf32>
    %457 = vector.broadcast %455 : vector<1x1x256xf32> to vector<1x4x256xf32>
    %458 = arith.mulf %456, %457 : vector<1x4x256xf32>
    %459 = arith.addf %452, %458 : vector<1x4x256xf32>
    %460 = vector.extract_strided_slice %438 {offsets = [0, 3], sizes = [4, 1], strides = [1, 1]} : vector<4x4xf32> to vector<4x1xf32>
    %461 = vector.shape_cast %460 : vector<4x1xf32> to vector<1x4x1xf32>
    %462 = vector.extract_strided_slice %395 {offsets = [0, 3, 0], sizes = [1, 1, 256], strides = [1, 1, 1]} : vector<1x4x256xf32> to vector<1x1x256xf32>
    %463 = vector.broadcast %461 : vector<1x4x1xf32> to vector<1x4x256xf32>
    %464 = vector.broadcast %462 : vector<1x1x256xf32> to vector<1x4x256xf32>
    %465 = arith.mulf %463, %464 : vector<1x4x256xf32>
    %466 = arith.addf %459, %465 : vector<1x4x256xf32>
    %467 = vector.extract_strided_slice %395 {offsets = [0, 0, 16], sizes = [1, 4, 240], strides = [1, 1, 1]} : vector<1x4x256xf32> to vector<1x4x240xf32>
    %468 = vector.extract_strided_slice %395 {offsets = [0, 0, 0], sizes = [1, 4, 16], strides = [1, 1, 1]} : vector<1x4x256xf32> to vector<1x4x16xf32>
    %469 = tpu.concatenate %467, %468 in 2 : vector<1x4x240xf32>, vector<1x4x16xf32> -> vector<1x4x256xf32>
    %470 = vector.extract_strided_slice %395 {offsets = [0, 0, 240], sizes = [1, 4, 16], strides = [1, 1, 1]} : vector<1x4x256xf32> to vector<1x4x16xf32>
    %471 = vector.extract_strided_slice %395 {offsets = [0, 0, 0], sizes = [1, 4, 240], strides = [1, 1, 1]} : vector<1x4x256xf32> to vector<1x4x240xf32>
    %472 = tpu.concatenate %470, %471 in 2 : vector<1x4x16xf32>, vector<1x4x240xf32> -> vector<1x4x256xf32>
    %c15_i32_25 = arith.constant 15 : i32
    %473 = vector.broadcast %c15_i32_25 : i32 to vector<1x256xi32>
    %474 = arith.cmpi eq, %2, %473 : vector<1x256xi32>
    %475 = vector.shape_cast %474 : vector<1x256xi1> to vector<1x1x256xi1>
    %476 = vector.broadcast %475 : vector<1x1x256xi1> to vector<1x4x256xi1>
    %477 = arith.select %476, %472, %469 : vector<1x4x256xi1>, vector<1x4x256xf32>
    %478 = vector.extract_strided_slice %383 {offsets = [6, 0, 0], sizes = [1, 4, 4], strides = [1, 1, 1]} : vector<9x4x4xf32> to vector<1x4x4xf32>
    %479 = vector.shape_cast %478 : vector<1x4x4xf32> to vector<4x4xf32>
    %480 = vector.extract_strided_slice %479 {offsets = [0, 0], sizes = [4, 1], strides = [1, 1]} : vector<4x4xf32> to vector<4x1xf32>
    %481 = vector.shape_cast %480 : vector<4x1xf32> to vector<1x4x1xf32>
    %482 = vector.extract_strided_slice %477 {offsets = [0, 0, 0], sizes = [1, 1, 256], strides = [1, 1, 1]} : vector<1x4x256xf32> to vector<1x1x256xf32>
    %483 = vector.broadcast %481 : vector<1x4x1xf32> to vector<1x4x256xf32>
    %484 = vector.broadcast %482 : vector<1x1x256xf32> to vector<1x4x256xf32>
    %485 = arith.mulf %483, %484 : vector<1x4x256xf32>
    %486 = arith.addf %466, %485 : vector<1x4x256xf32>
    %487 = vector.extract_strided_slice %479 {offsets = [0, 1], sizes = [4, 1], strides = [1, 1]} : vector<4x4xf32> to vector<4x1xf32>
    %488 = vector.shape_cast %487 : vector<4x1xf32> to vector<1x4x1xf32>
    %489 = vector.extract_strided_slice %477 {offsets = [0, 1, 0], sizes = [1, 1, 256], strides = [1, 1, 1]} : vector<1x4x256xf32> to vector<1x1x256xf32>
    %490 = vector.broadcast %488 : vector<1x4x1xf32> to vector<1x4x256xf32>
    %491 = vector.broadcast %489 : vector<1x1x256xf32> to vector<1x4x256xf32>
    %492 = arith.mulf %490, %491 : vector<1x4x256xf32>
    %493 = arith.addf %486, %492 : vector<1x4x256xf32>
    %494 = vector.extract_strided_slice %479 {offsets = [0, 2], sizes = [4, 1], strides = [1, 1]} : vector<4x4xf32> to vector<4x1xf32>
    %495 = vector.shape_cast %494 : vector<4x1xf32> to vector<1x4x1xf32>
    %496 = vector.extract_strided_slice %477 {offsets = [0, 2, 0], sizes = [1, 1, 256], strides = [1, 1, 1]} : vector<1x4x256xf32> to vector<1x1x256xf32>
    %497 = vector.broadcast %495 : vector<1x4x1xf32> to vector<1x4x256xf32>
    %498 = vector.broadcast %496 : vector<1x1x256xf32> to vector<1x4x256xf32>
    %499 = arith.mulf %497, %498 : vector<1x4x256xf32>
    %500 = arith.addf %493, %499 : vector<1x4x256xf32>
    %501 = vector.extract_strided_slice %479 {offsets = [0, 3], sizes = [4, 1], strides = [1, 1]} : vector<4x4xf32> to vector<4x1xf32>
    %502 = vector.shape_cast %501 : vector<4x1xf32> to vector<1x4x1xf32>
    %503 = vector.extract_strided_slice %477 {offsets = [0, 3, 0], sizes = [1, 1, 256], strides = [1, 1, 1]} : vector<1x4x256xf32> to vector<1x1x256xf32>
    %504 = vector.broadcast %502 : vector<1x4x1xf32> to vector<1x4x256xf32>
    %505 = vector.broadcast %503 : vector<1x1x256xf32> to vector<1x4x256xf32>
    %506 = arith.mulf %504, %505 : vector<1x4x256xf32>
    %507 = arith.addf %500, %506 : vector<1x4x256xf32>
    %508 = vector.extract_strided_slice %382 {offsets = [0, 0, 240], sizes = [1, 4, 16], strides = [1, 1, 1]} : vector<1x4x256xf32> to vector<1x4x16xf32>
    %509 = vector.extract_strided_slice %382 {offsets = [0, 0, 0], sizes = [1, 4, 240], strides = [1, 1, 1]} : vector<1x4x256xf32> to vector<1x4x240xf32>
    %510 = tpu.concatenate %508, %509 in 2 : vector<1x4x16xf32>, vector<1x4x240xf32> -> vector<1x4x256xf32>
    %511 = vector.extract_strided_slice %382 {offsets = [0, 0, 16], sizes = [1, 4, 240], strides = [1, 1, 1]} : vector<1x4x256xf32> to vector<1x4x240xf32>
    %512 = vector.extract_strided_slice %382 {offsets = [0, 0, 0], sizes = [1, 4, 16], strides = [1, 1, 1]} : vector<1x4x256xf32> to vector<1x4x16xf32>
    %513 = tpu.concatenate %511, %512 in 2 : vector<1x4x240xf32>, vector<1x4x16xf32> -> vector<1x4x256xf32>
    %c0_i32_26 = arith.constant 0 : i32
    %514 = vector.broadcast %c0_i32_26 : i32 to vector<1x256xi32>
    %515 = arith.cmpi eq, %2, %514 : vector<1x256xi32>
    %516 = vector.shape_cast %515 : vector<1x256xi1> to vector<1x1x256xi1>
    %517 = vector.broadcast %516 : vector<1x1x256xi1> to vector<1x4x256xi1>
    %518 = arith.select %517, %513, %510 : vector<1x4x256xi1>, vector<1x4x256xf32>
    %519 = vector.extract_strided_slice %383 {offsets = [1, 0, 0], sizes = [1, 4, 4], strides = [1, 1, 1]} : vector<9x4x4xf32> to vector<1x4x4xf32>
    %520 = vector.shape_cast %519 : vector<1x4x4xf32> to vector<4x4xf32>
    %521 = vector.extract_strided_slice %520 {offsets = [0, 0], sizes = [4, 1], strides = [1, 1]} : vector<4x4xf32> to vector<4x1xf32>
    %522 = vector.shape_cast %521 : vector<4x1xf32> to vector<1x4x1xf32>
    %523 = vector.extract_strided_slice %518 {offsets = [0, 0, 0], sizes = [1, 1, 256], strides = [1, 1, 1]} : vector<1x4x256xf32> to vector<1x1x256xf32>
    %524 = vector.broadcast %522 : vector<1x4x1xf32> to vector<1x4x256xf32>
    %525 = vector.broadcast %523 : vector<1x1x256xf32> to vector<1x4x256xf32>
    %526 = arith.mulf %524, %525 : vector<1x4x256xf32>
    %527 = arith.addf %507, %526 : vector<1x4x256xf32>
    %528 = vector.extract_strided_slice %520 {offsets = [0, 1], sizes = [4, 1], strides = [1, 1]} : vector<4x4xf32> to vector<4x1xf32>
    %529 = vector.shape_cast %528 : vector<4x1xf32> to vector<1x4x1xf32>
    %530 = vector.extract_strided_slice %518 {offsets = [0, 1, 0], sizes = [1, 1, 256], strides = [1, 1, 1]} : vector<1x4x256xf32> to vector<1x1x256xf32>
    %531 = vector.broadcast %529 : vector<1x4x1xf32> to vector<1x4x256xf32>
    %532 = vector.broadcast %530 : vector<1x1x256xf32> to vector<1x4x256xf32>
    %533 = arith.mulf %531, %532 : vector<1x4x256xf32>
    %534 = arith.addf %527, %533 : vector<1x4x256xf32>
    %535 = vector.extract_strided_slice %520 {offsets = [0, 2], sizes = [4, 1], strides = [1, 1]} : vector<4x4xf32> to vector<4x1xf32>
    %536 = vector.shape_cast %535 : vector<4x1xf32> to vector<1x4x1xf32>
    %537 = vector.extract_strided_slice %518 {offsets = [0, 2, 0], sizes = [1, 1, 256], strides = [1, 1, 1]} : vector<1x4x256xf32> to vector<1x1x256xf32>
    %538 = vector.broadcast %536 : vector<1x4x1xf32> to vector<1x4x256xf32>
    %539 = vector.broadcast %537 : vector<1x1x256xf32> to vector<1x4x256xf32>
    %540 = arith.mulf %538, %539 : vector<1x4x256xf32>
    %541 = arith.addf %534, %540 : vector<1x4x256xf32>
    %542 = vector.extract_strided_slice %520 {offsets = [0, 3], sizes = [4, 1], strides = [1, 1]} : vector<4x4xf32> to vector<4x1xf32>
    %543 = vector.shape_cast %542 : vector<4x1xf32> to vector<1x4x1xf32>
    %544 = vector.extract_strided_slice %518 {offsets = [0, 3, 0], sizes = [1, 1, 256], strides = [1, 1, 1]} : vector<1x4x256xf32> to vector<1x1x256xf32>
    %545 = vector.broadcast %543 : vector<1x4x1xf32> to vector<1x4x256xf32>
    %546 = vector.broadcast %544 : vector<1x1x256xf32> to vector<1x4x256xf32>
    %547 = arith.mulf %545, %546 : vector<1x4x256xf32>
    %548 = arith.addf %541, %547 : vector<1x4x256xf32>
    %549 = vector.extract_strided_slice %383 {offsets = [4, 0, 0], sizes = [1, 4, 4], strides = [1, 1, 1]} : vector<9x4x4xf32> to vector<1x4x4xf32>
    %550 = vector.shape_cast %549 : vector<1x4x4xf32> to vector<4x4xf32>
    %551 = vector.extract_strided_slice %550 {offsets = [0, 0], sizes = [4, 1], strides = [1, 1]} : vector<4x4xf32> to vector<4x1xf32>
    %552 = vector.shape_cast %551 : vector<4x1xf32> to vector<1x4x1xf32>
    %553 = vector.extract_strided_slice %382 {offsets = [0, 0, 0], sizes = [1, 1, 256], strides = [1, 1, 1]} : vector<1x4x256xf32> to vector<1x1x256xf32>
    %554 = vector.broadcast %552 : vector<1x4x1xf32> to vector<1x4x256xf32>
    %555 = vector.broadcast %553 : vector<1x1x256xf32> to vector<1x4x256xf32>
    %556 = arith.mulf %554, %555 : vector<1x4x256xf32>
    %557 = arith.addf %548, %556 : vector<1x4x256xf32>
    %558 = vector.extract_strided_slice %550 {offsets = [0, 1], sizes = [4, 1], strides = [1, 1]} : vector<4x4xf32> to vector<4x1xf32>
    %559 = vector.shape_cast %558 : vector<4x1xf32> to vector<1x4x1xf32>
    %560 = vector.extract_strided_slice %382 {offsets = [0, 1, 0], sizes = [1, 1, 256], strides = [1, 1, 1]} : vector<1x4x256xf32> to vector<1x1x256xf32>
    %561 = vector.broadcast %559 : vector<1x4x1xf32> to vector<1x4x256xf32>
    %562 = vector.broadcast %560 : vector<1x1x256xf32> to vector<1x4x256xf32>
    %563 = arith.mulf %561, %562 : vector<1x4x256xf32>
    %564 = arith.addf %557, %563 : vector<1x4x256xf32>
    %565 = vector.extract_strided_slice %550 {offsets = [0, 2], sizes = [4, 1], strides = [1, 1]} : vector<4x4xf32> to vector<4x1xf32>
    %566 = vector.shape_cast %565 : vector<4x1xf32> to vector<1x4x1xf32>
    %567 = vector.extract_strided_slice %382 {offsets = [0, 2, 0], sizes = [1, 1, 256], strides = [1, 1, 1]} : vector<1x4x256xf32> to vector<1x1x256xf32>
    %568 = vector.broadcast %566 : vector<1x4x1xf32> to vector<1x4x256xf32>
    %569 = vector.broadcast %567 : vector<1x1x256xf32> to vector<1x4x256xf32>
    %570 = arith.mulf %568, %569 : vector<1x4x256xf32>
    %571 = arith.addf %564, %570 : vector<1x4x256xf32>
    %572 = vector.extract_strided_slice %550 {offsets = [0, 3], sizes = [4, 1], strides = [1, 1]} : vector<4x4xf32> to vector<4x1xf32>
    %573 = vector.shape_cast %572 : vector<4x1xf32> to vector<1x4x1xf32>
    %574 = vector.extract_strided_slice %382 {offsets = [0, 3, 0], sizes = [1, 1, 256], strides = [1, 1, 1]} : vector<1x4x256xf32> to vector<1x1x256xf32>
    %575 = vector.broadcast %573 : vector<1x4x1xf32> to vector<1x4x256xf32>
    %576 = vector.broadcast %574 : vector<1x1x256xf32> to vector<1x4x256xf32>
    %577 = arith.mulf %575, %576 : vector<1x4x256xf32>
    %578 = arith.addf %571, %577 : vector<1x4x256xf32>
    %579 = vector.extract_strided_slice %382 {offsets = [0, 0, 16], sizes = [1, 4, 240], strides = [1, 1, 1]} : vector<1x4x256xf32> to vector<1x4x240xf32>
    %580 = vector.extract_strided_slice %382 {offsets = [0, 0, 0], sizes = [1, 4, 16], strides = [1, 1, 1]} : vector<1x4x256xf32> to vector<1x4x16xf32>
    %581 = tpu.concatenate %579, %580 in 2 : vector<1x4x240xf32>, vector<1x4x16xf32> -> vector<1x4x256xf32>
    %582 = vector.extract_strided_slice %382 {offsets = [0, 0, 240], sizes = [1, 4, 16], strides = [1, 1, 1]} : vector<1x4x256xf32> to vector<1x4x16xf32>
    %583 = vector.extract_strided_slice %382 {offsets = [0, 0, 0], sizes = [1, 4, 240], strides = [1, 1, 1]} : vector<1x4x256xf32> to vector<1x4x240xf32>
    %584 = tpu.concatenate %582, %583 in 2 : vector<1x4x16xf32>, vector<1x4x240xf32> -> vector<1x4x256xf32>
    %c15_i32_27 = arith.constant 15 : i32
    %585 = vector.broadcast %c15_i32_27 : i32 to vector<1x256xi32>
    %586 = arith.cmpi eq, %2, %585 : vector<1x256xi32>
    %587 = vector.shape_cast %586 : vector<1x256xi1> to vector<1x1x256xi1>
    %588 = vector.broadcast %587 : vector<1x1x256xi1> to vector<1x4x256xi1>
    %589 = arith.select %588, %584, %581 : vector<1x4x256xi1>, vector<1x4x256xf32>
    %590 = vector.extract_strided_slice %383 {offsets = [7, 0, 0], sizes = [1, 4, 4], strides = [1, 1, 1]} : vector<9x4x4xf32> to vector<1x4x4xf32>
    %591 = vector.shape_cast %590 : vector<1x4x4xf32> to vector<4x4xf32>
    %592 = vector.extract_strided_slice %591 {offsets = [0, 0], sizes = [4, 1], strides = [1, 1]} : vector<4x4xf32> to vector<4x1xf32>
    %593 = vector.shape_cast %592 : vector<4x1xf32> to vector<1x4x1xf32>
    %594 = vector.extract_strided_slice %589 {offsets = [0, 0, 0], sizes = [1, 1, 256], strides = [1, 1, 1]} : vector<1x4x256xf32> to vector<1x1x256xf32>
    %595 = vector.broadcast %593 : vector<1x4x1xf32> to vector<1x4x256xf32>
    %596 = vector.broadcast %594 : vector<1x1x256xf32> to vector<1x4x256xf32>
    %597 = arith.mulf %595, %596 : vector<1x4x256xf32>
    %598 = arith.addf %578, %597 : vector<1x4x256xf32>
    %599 = vector.extract_strided_slice %591 {offsets = [0, 1], sizes = [4, 1], strides = [1, 1]} : vector<4x4xf32> to vector<4x1xf32>
    %600 = vector.shape_cast %599 : vector<4x1xf32> to vector<1x4x1xf32>
    %601 = vector.extract_strided_slice %589 {offsets = [0, 1, 0], sizes = [1, 1, 256], strides = [1, 1, 1]} : vector<1x4x256xf32> to vector<1x1x256xf32>
    %602 = vector.broadcast %600 : vector<1x4x1xf32> to vector<1x4x256xf32>
    %603 = vector.broadcast %601 : vector<1x1x256xf32> to vector<1x4x256xf32>
    %604 = arith.mulf %602, %603 : vector<1x4x256xf32>
    %605 = arith.addf %598, %604 : vector<1x4x256xf32>
    %606 = vector.extract_strided_slice %591 {offsets = [0, 2], sizes = [4, 1], strides = [1, 1]} : vector<4x4xf32> to vector<4x1xf32>
    %607 = vector.shape_cast %606 : vector<4x1xf32> to vector<1x4x1xf32>
    %608 = vector.extract_strided_slice %589 {offsets = [0, 2, 0], sizes = [1, 1, 256], strides = [1, 1, 1]} : vector<1x4x256xf32> to vector<1x1x256xf32>
    %609 = vector.broadcast %607 : vector<1x4x1xf32> to vector<1x4x256xf32>
    %610 = vector.broadcast %608 : vector<1x1x256xf32> to vector<1x4x256xf32>
    %611 = arith.mulf %609, %610 : vector<1x4x256xf32>
    %612 = arith.addf %605, %611 : vector<1x4x256xf32>
    %613 = vector.extract_strided_slice %591 {offsets = [0, 3], sizes = [4, 1], strides = [1, 1]} : vector<4x4xf32> to vector<4x1xf32>
    %614 = vector.shape_cast %613 : vector<4x1xf32> to vector<1x4x1xf32>
    %615 = vector.extract_strided_slice %589 {offsets = [0, 3, 0], sizes = [1, 1, 256], strides = [1, 1, 1]} : vector<1x4x256xf32> to vector<1x1x256xf32>
    %616 = vector.broadcast %614 : vector<1x4x1xf32> to vector<1x4x256xf32>
    %617 = vector.broadcast %615 : vector<1x1x256xf32> to vector<1x4x256xf32>
    %618 = arith.mulf %616, %617 : vector<1x4x256xf32>
    %619 = arith.addf %612, %618 : vector<1x4x256xf32>
    %620 = vector.extract_strided_slice %382 {offsets = [0, 0, 1], sizes = [1, 4, 255], strides = [1, 1, 1]} : vector<1x4x256xf32> to vector<1x4x255xf32>
    %621 = vector.extract_strided_slice %382 {offsets = [0, 0, 0], sizes = [1, 4, 1], strides = [1, 1, 1]} : vector<1x4x256xf32> to vector<1x4x1xf32>
    %622 = tpu.concatenate %620, %621 in 2 : vector<1x4x255xf32>, vector<1x4x1xf32> -> vector<1x4x256xf32>
    %623 = vector.extract_strided_slice %382 {offsets = [0, 0, 255], sizes = [1, 4, 1], strides = [1, 1, 1]} : vector<1x4x256xf32> to vector<1x4x1xf32>
    %624 = vector.extract_strided_slice %382 {offsets = [0, 0, 0], sizes = [1, 4, 255], strides = [1, 1, 1]} : vector<1x4x256xf32> to vector<1x4x255xf32>
    %625 = tpu.concatenate %623, %624 in 2 : vector<1x4x1xf32>, vector<1x4x255xf32> -> vector<1x4x256xf32>
    %c15_i32_28 = arith.constant 15 : i32
    %626 = vector.broadcast %c15_i32_28 : i32 to vector<1x256xi32>
    %627 = arith.cmpi eq, %3, %626 : vector<1x256xi32>
    %628 = vector.shape_cast %627 : vector<1x256xi1> to vector<1x1x256xi1>
    %629 = vector.broadcast %628 : vector<1x1x256xi1> to vector<1x4x256xi1>
    %630 = arith.select %629, %625, %622 : vector<1x4x256xi1>, vector<1x4x256xf32>
    %631 = vector.extract_strided_slice %630 {offsets = [0, 0, 240], sizes = [1, 4, 16], strides = [1, 1, 1]} : vector<1x4x256xf32> to vector<1x4x16xf32>
    %632 = vector.extract_strided_slice %630 {offsets = [0, 0, 0], sizes = [1, 4, 240], strides = [1, 1, 1]} : vector<1x4x256xf32> to vector<1x4x240xf32>
    %633 = tpu.concatenate %631, %632 in 2 : vector<1x4x16xf32>, vector<1x4x240xf32> -> vector<1x4x256xf32>
    %634 = vector.extract_strided_slice %630 {offsets = [0, 0, 16], sizes = [1, 4, 240], strides = [1, 1, 1]} : vector<1x4x256xf32> to vector<1x4x240xf32>
    %635 = vector.extract_strided_slice %630 {offsets = [0, 0, 0], sizes = [1, 4, 16], strides = [1, 1, 1]} : vector<1x4x256xf32> to vector<1x4x16xf32>
    %636 = tpu.concatenate %634, %635 in 2 : vector<1x4x240xf32>, vector<1x4x16xf32> -> vector<1x4x256xf32>
    %c0_i32_29 = arith.constant 0 : i32
    %637 = vector.broadcast %c0_i32_29 : i32 to vector<1x256xi32>
    %638 = arith.cmpi eq, %2, %637 : vector<1x256xi32>
    %639 = vector.shape_cast %638 : vector<1x256xi1> to vector<1x1x256xi1>
    %640 = vector.broadcast %639 : vector<1x1x256xi1> to vector<1x4x256xi1>
    %641 = arith.select %640, %636, %633 : vector<1x4x256xi1>, vector<1x4x256xf32>
    %642 = vector.extract_strided_slice %383 {offsets = [2, 0, 0], sizes = [1, 4, 4], strides = [1, 1, 1]} : vector<9x4x4xf32> to vector<1x4x4xf32>
    %643 = vector.shape_cast %642 : vector<1x4x4xf32> to vector<4x4xf32>
    %644 = vector.extract_strided_slice %643 {offsets = [0, 0], sizes = [4, 1], strides = [1, 1]} : vector<4x4xf32> to vector<4x1xf32>
    %645 = vector.shape_cast %644 : vector<4x1xf32> to vector<1x4x1xf32>
    %646 = vector.extract_strided_slice %641 {offsets = [0, 0, 0], sizes = [1, 1, 256], strides = [1, 1, 1]} : vector<1x4x256xf32> to vector<1x1x256xf32>
    %647 = vector.broadcast %645 : vector<1x4x1xf32> to vector<1x4x256xf32>
    %648 = vector.broadcast %646 : vector<1x1x256xf32> to vector<1x4x256xf32>
    %649 = arith.mulf %647, %648 : vector<1x4x256xf32>
    %650 = arith.addf %619, %649 : vector<1x4x256xf32>
    %651 = vector.extract_strided_slice %643 {offsets = [0, 1], sizes = [4, 1], strides = [1, 1]} : vector<4x4xf32> to vector<4x1xf32>
    %652 = vector.shape_cast %651 : vector<4x1xf32> to vector<1x4x1xf32>
    %653 = vector.extract_strided_slice %641 {offsets = [0, 1, 0], sizes = [1, 1, 256], strides = [1, 1, 1]} : vector<1x4x256xf32> to vector<1x1x256xf32>
    %654 = vector.broadcast %652 : vector<1x4x1xf32> to vector<1x4x256xf32>
    %655 = vector.broadcast %653 : vector<1x1x256xf32> to vector<1x4x256xf32>
    %656 = arith.mulf %654, %655 : vector<1x4x256xf32>
    %657 = arith.addf %650, %656 : vector<1x4x256xf32>
    %658 = vector.extract_strided_slice %643 {offsets = [0, 2], sizes = [4, 1], strides = [1, 1]} : vector<4x4xf32> to vector<4x1xf32>
    %659 = vector.shape_cast %658 : vector<4x1xf32> to vector<1x4x1xf32>
    %660 = vector.extract_strided_slice %641 {offsets = [0, 2, 0], sizes = [1, 1, 256], strides = [1, 1, 1]} : vector<1x4x256xf32> to vector<1x1x256xf32>
    %661 = vector.broadcast %659 : vector<1x4x1xf32> to vector<1x4x256xf32>
    %662 = vector.broadcast %660 : vector<1x1x256xf32> to vector<1x4x256xf32>
    %663 = arith.mulf %661, %662 : vector<1x4x256xf32>
    %664 = arith.addf %657, %663 : vector<1x4x256xf32>
    %665 = vector.extract_strided_slice %643 {offsets = [0, 3], sizes = [4, 1], strides = [1, 1]} : vector<4x4xf32> to vector<4x1xf32>
    %666 = vector.shape_cast %665 : vector<4x1xf32> to vector<1x4x1xf32>
    %667 = vector.extract_strided_slice %641 {offsets = [0, 3, 0], sizes = [1, 1, 256], strides = [1, 1, 1]} : vector<1x4x256xf32> to vector<1x1x256xf32>
    %668 = vector.broadcast %666 : vector<1x4x1xf32> to vector<1x4x256xf32>
    %669 = vector.broadcast %667 : vector<1x1x256xf32> to vector<1x4x256xf32>
    %670 = arith.mulf %668, %669 : vector<1x4x256xf32>
    %671 = arith.addf %664, %670 : vector<1x4x256xf32>
    %672 = vector.extract_strided_slice %383 {offsets = [5, 0, 0], sizes = [1, 4, 4], strides = [1, 1, 1]} : vector<9x4x4xf32> to vector<1x4x4xf32>
    %673 = vector.shape_cast %672 : vector<1x4x4xf32> to vector<4x4xf32>
    %674 = vector.extract_strided_slice %673 {offsets = [0, 0], sizes = [4, 1], strides = [1, 1]} : vector<4x4xf32> to vector<4x1xf32>
    %675 = vector.shape_cast %674 : vector<4x1xf32> to vector<1x4x1xf32>
    %676 = vector.extract_strided_slice %630 {offsets = [0, 0, 0], sizes = [1, 1, 256], strides = [1, 1, 1]} : vector<1x4x256xf32> to vector<1x1x256xf32>
    %677 = vector.broadcast %675 : vector<1x4x1xf32> to vector<1x4x256xf32>
    %678 = vector.broadcast %676 : vector<1x1x256xf32> to vector<1x4x256xf32>
    %679 = arith.mulf %677, %678 : vector<1x4x256xf32>
    %680 = arith.addf %671, %679 : vector<1x4x256xf32>
    %681 = vector.extract_strided_slice %673 {offsets = [0, 1], sizes = [4, 1], strides = [1, 1]} : vector<4x4xf32> to vector<4x1xf32>
    %682 = vector.shape_cast %681 : vector<4x1xf32> to vector<1x4x1xf32>
    %683 = vector.extract_strided_slice %630 {offsets = [0, 1, 0], sizes = [1, 1, 256], strides = [1, 1, 1]} : vector<1x4x256xf32> to vector<1x1x256xf32>
    %684 = vector.broadcast %682 : vector<1x4x1xf32> to vector<1x4x256xf32>
    %685 = vector.broadcast %683 : vector<1x1x256xf32> to vector<1x4x256xf32>
    %686 = arith.mulf %684, %685 : vector<1x4x256xf32>
    %687 = arith.addf %680, %686 : vector<1x4x256xf32>
    %688 = vector.extract_strided_slice %673 {offsets = [0, 2], sizes = [4, 1], strides = [1, 1]} : vector<4x4xf32> to vector<4x1xf32>
    %689 = vector.shape_cast %688 : vector<4x1xf32> to vector<1x4x1xf32>
    %690 = vector.extract_strided_slice %630 {offsets = [0, 2, 0], sizes = [1, 1, 256], strides = [1, 1, 1]} : vector<1x4x256xf32> to vector<1x1x256xf32>
    %691 = vector.broadcast %689 : vector<1x4x1xf32> to vector<1x4x256xf32>
    %692 = vector.broadcast %690 : vector<1x1x256xf32> to vector<1x4x256xf32>
    %693 = arith.mulf %691, %692 : vector<1x4x256xf32>
    %694 = arith.addf %687, %693 : vector<1x4x256xf32>
    %695 = vector.extract_strided_slice %673 {offsets = [0, 3], sizes = [4, 1], strides = [1, 1]} : vector<4x4xf32> to vector<4x1xf32>
    %696 = vector.shape_cast %695 : vector<4x1xf32> to vector<1x4x1xf32>
    %697 = vector.extract_strided_slice %630 {offsets = [0, 3, 0], sizes = [1, 1, 256], strides = [1, 1, 1]} : vector<1x4x256xf32> to vector<1x1x256xf32>
    %698 = vector.broadcast %696 : vector<1x4x1xf32> to vector<1x4x256xf32>
    %699 = vector.broadcast %697 : vector<1x1x256xf32> to vector<1x4x256xf32>
    %700 = arith.mulf %698, %699 : vector<1x4x256xf32>
    %701 = arith.addf %694, %700 : vector<1x4x256xf32>
    %702 = vector.extract_strided_slice %630 {offsets = [0, 0, 16], sizes = [1, 4, 240], strides = [1, 1, 1]} : vector<1x4x256xf32> to vector<1x4x240xf32>
    %703 = vector.extract_strided_slice %630 {offsets = [0, 0, 0], sizes = [1, 4, 16], strides = [1, 1, 1]} : vector<1x4x256xf32> to vector<1x4x16xf32>
    %704 = tpu.concatenate %702, %703 in 2 : vector<1x4x240xf32>, vector<1x4x16xf32> -> vector<1x4x256xf32>
    %705 = vector.extract_strided_slice %630 {offsets = [0, 0, 240], sizes = [1, 4, 16], strides = [1, 1, 1]} : vector<1x4x256xf32> to vector<1x4x16xf32>
    %706 = vector.extract_strided_slice %630 {offsets = [0, 0, 0], sizes = [1, 4, 240], strides = [1, 1, 1]} : vector<1x4x256xf32> to vector<1x4x240xf32>
    %707 = tpu.concatenate %705, %706 in 2 : vector<1x4x16xf32>, vector<1x4x240xf32> -> vector<1x4x256xf32>
    %c15_i32_30 = arith.constant 15 : i32
    %708 = vector.broadcast %c15_i32_30 : i32 to vector<1x256xi32>
    %709 = arith.cmpi eq, %2, %708 : vector<1x256xi32>
    %710 = vector.shape_cast %709 : vector<1x256xi1> to vector<1x1x256xi1>
    %711 = vector.broadcast %710 : vector<1x1x256xi1> to vector<1x4x256xi1>
    %712 = arith.select %711, %707, %704 : vector<1x4x256xi1>, vector<1x4x256xf32>
    %713 = vector.extract_strided_slice %383 {offsets = [8, 0, 0], sizes = [1, 4, 4], strides = [1, 1, 1]} : vector<9x4x4xf32> to vector<1x4x4xf32>
    %714 = vector.shape_cast %713 : vector<1x4x4xf32> to vector<4x4xf32>
    %715 = vector.extract_strided_slice %714 {offsets = [0, 0], sizes = [4, 1], strides = [1, 1]} : vector<4x4xf32> to vector<4x1xf32>
    %716 = vector.shape_cast %715 : vector<4x1xf32> to vector<1x4x1xf32>
    %717 = vector.extract_strided_slice %712 {offsets = [0, 0, 0], sizes = [1, 1, 256], strides = [1, 1, 1]} : vector<1x4x256xf32> to vector<1x1x256xf32>
    %718 = vector.broadcast %716 : vector<1x4x1xf32> to vector<1x4x256xf32>
    %719 = vector.broadcast %717 : vector<1x1x256xf32> to vector<1x4x256xf32>
    %720 = arith.mulf %718, %719 : vector<1x4x256xf32>
    %721 = arith.addf %701, %720 : vector<1x4x256xf32>
    %722 = vector.extract_strided_slice %714 {offsets = [0, 1], sizes = [4, 1], strides = [1, 1]} : vector<4x4xf32> to vector<4x1xf32>
    %723 = vector.shape_cast %722 : vector<4x1xf32> to vector<1x4x1xf32>
    %724 = vector.extract_strided_slice %712 {offsets = [0, 1, 0], sizes = [1, 1, 256], strides = [1, 1, 1]} : vector<1x4x256xf32> to vector<1x1x256xf32>
    %725 = vector.broadcast %723 : vector<1x4x1xf32> to vector<1x4x256xf32>
    %726 = vector.broadcast %724 : vector<1x1x256xf32> to vector<1x4x256xf32>
    %727 = arith.mulf %725, %726 : vector<1x4x256xf32>
    %728 = arith.addf %721, %727 : vector<1x4x256xf32>
    %729 = vector.extract_strided_slice %714 {offsets = [0, 2], sizes = [4, 1], strides = [1, 1]} : vector<4x4xf32> to vector<4x1xf32>
    %730 = vector.shape_cast %729 : vector<4x1xf32> to vector<1x4x1xf32>
    %731 = vector.extract_strided_slice %712 {offsets = [0, 2, 0], sizes = [1, 1, 256], strides = [1, 1, 1]} : vector<1x4x256xf32> to vector<1x1x256xf32>
    %732 = vector.broadcast %730 : vector<1x4x1xf32> to vector<1x4x256xf32>
    %733 = vector.broadcast %731 : vector<1x1x256xf32> to vector<1x4x256xf32>
    %734 = arith.mulf %732, %733 : vector<1x4x256xf32>
    %735 = arith.addf %728, %734 : vector<1x4x256xf32>
    %736 = vector.extract_strided_slice %714 {offsets = [0, 3], sizes = [4, 1], strides = [1, 1]} : vector<4x4xf32> to vector<4x1xf32>
    %737 = vector.shape_cast %736 : vector<4x1xf32> to vector<1x4x1xf32>
    %738 = vector.extract_strided_slice %712 {offsets = [0, 3, 0], sizes = [1, 1, 256], strides = [1, 1, 1]} : vector<1x4x256xf32> to vector<1x1x256xf32>
    %739 = vector.broadcast %737 : vector<1x4x1xf32> to vector<1x4x256xf32>
    %740 = vector.broadcast %738 : vector<1x1x256xf32> to vector<1x4x256xf32>
    %741 = arith.mulf %739, %740 : vector<1x4x256xf32>
    %742 = arith.addf %735, %741 : vector<1x4x256xf32>
    %cst_31 = arith.constant dense<0.000000e+00> : vector<1x4xf32>
    %743 = vector.multi_reduction <add>, %742, %cst_31 [2] : vector<1x4x256xf32> to vector<1x4xf32>
    %744 = vector.shape_cast %743 : vector<1x4xf32> to vector<1x4x1xf32>
    %cst_32 = arith.constant 3.906250e-03 : f32
    %745 = vector.broadcast %cst_32 : f32 to vector<1x4x1xf32>
    %746 = arith.mulf %744, %745 : vector<1x4x1xf32>
    %747 = vector.broadcast %746 : vector<1x4x1xf32> to vector<1x4x256xf32>
    %748 = arith.subf %742, %747 : vector<1x4x256xf32>
    %749 = arith.mulf %748, %748 : vector<1x4x256xf32>
    %cst_33 = arith.constant dense<0.000000e+00> : vector<1x4xf32>
    %750 = vector.multi_reduction <add>, %749, %cst_33 [2] : vector<1x4x256xf32> to vector<1x4xf32>
    %751 = vector.shape_cast %750 : vector<1x4xf32> to vector<1x4x1xf32>
    %cst_34 = arith.constant 3.906250e-03 : f32
    %752 = vector.broadcast %cst_34 : f32 to vector<1x4x1xf32>
    %753 = arith.mulf %751, %752 : vector<1x4x1xf32>
    %cst_35 = arith.constant 9.99999974E-6 : f32
    %754 = vector.broadcast %cst_35 : f32 to vector<1x4x1xf32>
    %755 = arith.addf %753, %754 : vector<1x4x1xf32>
    %756 = math.rsqrt %755 : vector<1x4x1xf32>
    %757 = vector.broadcast %756 : vector<1x4x1xf32> to vector<1x4x256xf32>
    %758 = arith.mulf %748, %757 : vector<1x4x256xf32>
    %759 = arith.addf %0, %758 : vector<1x4x256xf32>
    %c0_36 = arith.constant 0 : index
    %c0_37 = arith.constant 0 : index
    %c0_38 = arith.constant 0 : index
    %760 = vector.load %arg5[%c0_36, %c0_37, %c0_38] : memref<1x4x256xf32, #tpu.memory_space<vmem>>, vector<1x4x256xf32>
    tpu.vector_store %arg5[%c0_36, %c0_37, %c0_38], %759 {strides = array<i32>} : memref<1x4x256xf32, #tpu.memory_space<vmem>>, vector<1x4x256xf32>,
    return
  }
  func.func @transform_0(%arg0: i32) -> (i32, i32, i32) {
    %c0_i32 = arith.constant 0 : i32
    %c0_i32_0 = arith.constant 0 : i32
    %c0_i32_1 = arith.constant 0 : i32
    return %arg0, %c0_i32, %c0_i32_0 : i32, i32, i32
  }
  func.func @transform_1(%arg0: i32) -> (i32, i32, i32) {
    %c0_i32 = arith.constant 0 : i32
    %c0_i32_0 = arith.constant 0 : i32
    %c0_i32_1 = arith.constant 0 : i32
    %c0_i32_2 = arith.constant 0 : i32
    return %c0_i32, %c0_i32_0, %c0_i32_1 : i32, i32, i32
  }
  func.func @transform_2(%arg0: i32) -> (i32, i32, i32) {
    %c0_i32 = arith.constant 0 : i32
    %c0_i32_0 = arith.constant 0 : i32
    %c0_i32_1 = arith.constant 0 : i32
    %c0_i32_2 = arith.constant 0 : i32
    return %c0_i32, %c0_i32_0, %c0_i32_1 : i32, i32, i32
  }
  func.func @transform_3(%arg0: i32) -> (i32, i32) {
    %c0_i32 = arith.constant 0 : i32
    %c0_i32_0 = arith.constant 0 : i32
    %c0_i32_1 = arith.constant 0 : i32
    return %c0_i32, %c0_i32_0 : i32, i32
  }
  func.func @transform_4(%arg0: i32) -> (i32, i32, i32) {
    %c0_i32 = arith.constant 0 : i32
    %c0_i32_0 = arith.constant 0 : i32
    %c0_i32_1 = arith.constant 0 : i32
    return %arg0, %c0_i32, %c0_i32_0 : i32, i32, i32
  }
}

</mosaic_0001>

<bundles_post_ra>
// kernel: tpu_custom_call.1
= control target key start
LH: loop header
LB: loop body
LE: loop exit
PB: predicated region body
PF: predicated region fallthrough
CT: control target
= control target key end

     0   :  { %9 = vsyncpa [#allocation3], 0  ;;  %s2357_s0 = inlined_call_operand.vmem [shape: f32[2,4,256], index: 0, kind: input, shape index: {}]   ;;  %s2358_s1 = inlined_call_operand.vmem [shape: f32[9,4,4], index: 1, kind: input, shape index: {}]   ;;  %s2359_s2 = inlined_call_operand.vmem [shape: f32[9,4,4], index: 2, kind: input, shape index: {}]   ;;  %s2360_s3 = inlined_call_operand.vmem [shape: s32[2,256], index: 3, kind: input, shape index: {}]   ;;  %s2361_s4 = inlined_call_operand.hbm [shape: f32[2,4,256], index: 4, kind: output, shape index: {}]  }
   0x1   :  { %11 = vsyncpa [#allocation3 + $0x1], 0  ;;  %s1588_s15 = smov 0   ;;  %s1590_s16 = smov 0  }
   0x2   :  { %s1592_s17 = smov 0   ;;  %s1594_s18 = smov 0  }
   0x3 LB: > { %s1609_s19 = sadd.s32 4294967295, %s1553_s18   ;;  %s1363_s20 = sadd.s32 4294967294, %s1553_s18   ;;  %s1553_s18 = sphi %s1594_s18, %s2382_s18   ;;  %s1549_s17 = sphi %s1592_s17, %s2381_s17   ;;  %s1545_s16 = sphi %s1590_s16, %s2380_s16   ;;  %s1541_s15 = sphi %s1588_s15, %s2379_s15  }
   0x4   : > { %s1613_s21 = sadd.s32 1, %s1553_s18   ;;  %s113_s22 = sadd.s32 1, %s1549_s17 }
   0x5   : > { %s110_s23 = ssub.s32 %s1553_s18, %s1613_s21  ;;  %p123_p0 = scmp.ne.s32.totalorder %s1549_s17, %s1545_s16 }
   0x6   : > { %p111_p1 = scmp.eq.s32.totalorder %s110_s23, 0  ;;  %p124_p2 = scmp.eq.s32.totalorder %s1609_s19, 1 }
   0x7   : > { %p129_p3 = scmp.ne.s32.totalorder %s1545_s16, %s1541_s15  ;;  %p130_p4 = scmp.eq.s32.totalorder %s1363_s20, 1 }
   0x8   : > { %s1624_s24 = scalar_select %p111_p1, %s1549_s17, %s113_s22  }
   0x9   : > { %p1626_p5 = por %p124_p2, %p123_p0  ;;  %p1630_p6 = por %p130_p4, %p129_p3 }
   0xa   : > { %p1366_p7 = scmp.ge.s32.totalorder %s1553_s18, 1  ;;  %p165_p8 = scmp.lt.s32.totalorder %s1553_s18, 3 }
   0xc   : > { %p166_p9 = pnand %p1366_p7, %p165_p8 }
   0xe   : > { %169 = sbr.rel (%p166_p9) target bundleno = 1253 (0x4e5), region = 36 }
  0x13   : > { %v198_v0 = vld [vmem:[%s2358_s1] sm:$0xf]  ;;  %p191_p10 = scmp.lt.s32.totalorder %s1609_s19, 1  ;;  %v2362_v1 = vmov 0   ;;  %v2368_v2 = vmov 1   ;;  %v2364_v3 = vmov 2  }
  0x14   : > { %1424 = vset.pattern.permute.xlu1 %v2362_v1  ;;  %1425 = vset.pattern.permute.xlu2 %v2368_v2  ;;  %v201_v5 = vld [vmem:[%s2358_s1 + $0xc] sm:$0xf]  ;;  %v2366_v6 = vmov 3   ;;  %s1559_s10 = smov 1   ;;  %s1560_s11 = smov 127   ;;  %vm232_vm1 = vcmask 1039360  }
  0x15   : > { %284 = vperm.xlu1 %1424, %v198_v0   ;;  %294 = vperm.xlu2 %1425, %v198_v0   ;;  %s192_s29 = scalar_select %p191_p10, %s1609_s19, 1  ;;  %v204_v13 = vld [vmem:[%s2358_s1 + $0x18] sm:$0xf]  ;;  %v199_v20 = vld [vmem:[%s2358_s1 + $0x4] sm:$0xf]  ;;  %vm220_vm2 = vcmask 7168  }
  0x16   : > { %1426 = vset.pattern.permute.xlu0 %v2364_v3  ;;  %s1561_s14 = smov 16   ;;  %s1562_s20 = smov 112   ;;  %v202_v23 = vld [vmem:[%s2358_s1 + $0x10] sm:$0xf]  ;;  %v197_v26 = vld [vmem:[%s2360_s3] sm:$0xf] }
  0x17   : > { %s1375_s30 = sshll.u32 %s192_s29, 3  ;;  %vm242_vm0 = vcmp.eq.s32.totalorder %v197_v26, 0  ;;  %vm364_vm5 = vcmp.eq.s32.totalorder %v197_v26, 15  ;;  %v205_v60 = vld [vmem:[%s2358_s1 + $0x1c] sm:$0xf]  ;;  %vm268_vm8 = vcmask 916480  }
  0x18   : > { %s195_s7 = scalar_lea.vmem %s2357_s0, %s1375_s30  ;;  %v1706_v28 = vsel %vm242_vm0, 1, %v2362_v1  ;;  %v1757_v58 = vsel %vm364_vm5, 1, %v2362_v1  ;;  %vm259_vm9 = vcmask 130048   ;;  %vm745_vm14 = vcmask 1043456   ;;  %s1376_s29 = sshll.u32 %s1609_s19, 3 }
  0x19   : > { %v1647_v4 = vld [vmem:[%s195_s7] sm:$0xff]  ;;  %v245_v30 = vperm.slane %v1706_v28, 3  ;;  %v244_v34 = vperm.slane %v1706_v28, 1  ;;  %v590_v59 = vperm.slane %v1757_v58, 1  ;;  %v591_v63 = vperm.slane %v1757_v58, 3  ;;  %s1299_s6 = scalar_lea.hbm %s2361_s4, %s1376_s29  ;;  %s1511_s22 = scalar_lea.hbm %s2361_s4, 16 }
  0x1a   : > { %208 = vst [vmem:[#allocation1] ss:$2 sm:$0xff] %v1647_v4 }
  0x1b   : > { %v1711_v32 = vperm.slane %v245_v30, 1  ;;  %v1725_v42 = vperm.slane %v244_v34, 1  ;;  %v1766_v61 = vperm.slane %v590_v59, 1  ;;  %v274_v34 = vperm.slane %v1706_v28, 0 }
  0x1d   : > { %1427 = vset.pattern.permute.xlu1 %v2366_v6  ;;  %1428 = vset.pattern.permute.xlu2 %v2362_v1  ;;  %vm249_vm3 = vcmp.eq.s32.totalorder %v1711_v32, 1  ;;  %vm248_vm4 = vcmp.eq.s32.totalorder %v1725_v42, 1  ;;  %2373 = vst [vmem:[#allocation5_spill] sm:$0xff] %v1766_v61  ;;  %vm594_vm6 = vcmp.eq.s32.totalorder %v1766_v61, 1  ;;  %v783_v32 = vld [vmem:[%s2359_s2 + $0x10] sm:$0xf] }
  0x1e   : > { %314 = vperm.xlu1 %1427, %v198_v0   ;;  %325 = vperm.xlu2 %1428, %v201_v5  }
  0x21   : > { %v209_v7 = vld.sshfl [vmem:[#allocation1 + $0x8] sm:$0xff pattern:$0x75316420] }
  0x22   : > { %210 = vrot.lane.b32.xlu0 %v209_v7, %s1559_s10  ;;  %213 = vst [vmem:[#allocation1] ss:$2 sm:$0xff] %v1647_v4  ;;  %v1785_v7 = vperm.slane %v591_v63, 1 }
  0x24   : > { %vm595_vm7 = vcmp.eq.s32.totalorder %v1785_v7, 1 }
  0x26   : > { %1430 = vset.pattern.permute.xlu2 %v2364_v3  ;;  %1429 = vset.pattern.permute.xlu1 %v2368_v2 }
  0x27   : > { %345 = vperm.xlu2 %1430, %v201_v5  }
  0x29   : > { %v215_v8 = vld.sshfl [vmem:[#allocation1 + $0x8] sm:$0xff pattern:$0x75316420]  ;;  %v214_v9 = vld.sshfl [vmem:[#allocation1] sm:$0xff pattern:$0x75316420] }
  0x2a   : > { %218 = vrot.lane.b32.xlu1 %v215_v8, %s1559_s10  ;;  %216 = vrot.lane.b32.xlu0 %v214_v9, %s1559_s10  ;;  %225 = vst [vmem:[#allocation1] ss:$2 sm:$0xff] %v1647_v4  ;;  %v206_v9 = vld [vmem:[%s2358_s1 + $0x20] sm:$0xf] }
  0x2f   : > { %1433 = vset.pattern.permute.xlu2 %v2368_v2 }
  0x31   : > { %v226_v10 = vld.sshfl [vmem:[#allocation1] sm:$0xff pattern:$0x75316420]  ;;  %v227_v11 = vld.sshfl [vmem:[#allocation1 + $0x8] sm:$0xff pattern:$0x75316420] }
  0x32   : > { %304 = vperm.xlu0 %1426, %v198_v0   ;;  %228 = vrot.lane.b32.xlu1 %v226_v10, %s1560_s11  ;;  %236 = vst [vmem:[#allocation1] ss:$2 sm:$0xff] %v1647_v4  ;;  %v200_v0 = vld [vmem:[%s2358_s1 + $0x8] sm:$0xf] }
  0x33   : > { %230 = vrot.lane.b32.xlu2 %v227_v11, %s1560_s11 }
  0x39   : > { %v237_v12 = vld.sshfl [vmem:[#allocation1] sm:$0xff pattern:$0x75316420] }
  0x3a   : > { %1431 = vset.pattern.permute.xlu0 %v2366_v6  ;;  %335 = vperm.xlu1 %1429, %v201_v5   ;;  %415 = vst [vmem:[#allocation1] ss:$2 sm:$0xff] %v1647_v4 }
  0x3b   : > { %355 = vperm.xlu0 %1431, %v201_v5   ;;  %238 = vrot.lane.b32.xlu2 %v237_v12, %s1560_s11  ;;  %v203_v5 = vld [vmem:[%s2358_s1 + $0x14] sm:$0xf] }
  0x41   : > { %v416_v14 = vld.sshfl [vmem:[#allocation1 + $0x8] sm:$0xff pattern:$0x75316420] }
  0x42   : > { %420 = vst [vmem:[#allocation1] ss:$2 sm:$0xff] %v1647_v4  ;;  %1432 = vset.pattern.permute.xlu1 %v2362_v1 }
  0x43   : > { %376 = vperm.xlu1 %1432, %v204_v13   ;;  %386 = vperm.xlu2 %1433, %v204_v13  }
  0x44   : > { %1436 = vset.pattern.permute.xlu0 %v2362_v1 }
  0x49   : > { %v421_v15 = vld.sshfl [vmem:[#allocation1] sm:$0xff pattern:$0x75316420]  ;;  %v422_v16 = vld.sshfl [vmem:[#allocation1 + $0x8] sm:$0xff pattern:$0x75316420] }
  0x4a   : > { %431 = vst [vmem:[#allocation1] ss:$2 sm:$0xff] %v1647_v4  ;;  %423 = vrot.lane.b32.xlu0 %v421_v15, %s1561_s14 }
  0x4b   : > { %1434 = vset.pattern.permute.xlu1 %v2364_v3  ;;  %417 = vrot.lane.b32.xlu2 %v416_v14, %s1561_s14 }
  0x4c   : > { %396 = vperm.xlu1 %1434, %v204_v13   ;;  %1435 = vset.pattern.permute.xlu2 %v2366_v6 }
  0x51   : > { %v432_v17 = vld.sshfl [vmem:[#allocation1] sm:$0xff pattern:$0x75316420]  ;;  %v433_v18 = vld.sshfl [vmem:[#allocation1 + $0x8] sm:$0xff pattern:$0x75316420] }
  0x52   : > { %441 = vst [vmem:[#allocation1] ss:$2 sm:$0xff] %v1647_v4  ;;  %436 = vrot.lane.b32.xlu0 %v433_v18, %s1562_s20 }
  0x53   : > { %434 = vrot.lane.b32.xlu2 %v432_v17, %s1562_s20 }
  0x54   : > { %425 = vrot.lane.b32.xlu1 %v422_v16, %s1561_s14 }
  0x55   : > { %1437 = vset.pattern.permute.xlu1 %v2368_v2 }
  0x59   : > { %v442_v19 = vld.sshfl [vmem:[#allocation1] sm:$0xff pattern:$0x75316420] }
  0x5a   : > { %451 = vperm.xlu0 %1436, %v199_v20  }
  0x5b   : > { %406 = vperm.xlu2 %1435, %v204_v13  }
  0x5c   : > { %443 = vrot.lane.b32.xlu1 %v442_v19, %s1562_s20 }
  0x62   : > { %1441 = vset.pattern.permute.xlu0 %v2368_v2 }
  0x63   : > { %1438 = vset.pattern.permute.xlu2 %v2364_v3 }
  0x64   : > { %461 = vperm.xlu1 %1437, %v199_v20   ;;  %471 = vperm.xlu2 %1438, %v199_v20  }
  0x6c   : > { %1439 = vset.pattern.permute.xlu1 %v2366_v6  ;;  %1440 = vset.pattern.permute.xlu2 %v2362_v1 }
  0x6d   : > { %481 = vperm.xlu1 %1439, %v199_v20   ;;  %492 = vperm.xlu2 %1440, %v202_v23  }
  0x6f   : > { %v1693_v21 = vpop.permute.xlu2 %294 }
  0x75   : > { %1442 = vset.pattern.permute.xlu1 %v2364_v3  ;;  %1443 = vset.pattern.permute.xlu2 %v2366_v6 }
  0x78   : > { %v326_v22 = vpop.permute.xlu2 %325 }
  0x81   : > { %v346_v24 = vpop.permute.xlu2 %345 }
  0x87   : > { %v1700_v25 = vpop.permute.xlu1 %284 }
  0x8d   : > { %v231_v27 = vpop.permute.xlu2 %230 }
  0x90   : > { %v1708_v29 = vpop.permute.xlu1 %314 }
  0x94   : > { %v211_v31 = vpop.permute.xlu0 %210 }
  0x95   : > { %v239_v33 = vpop.permute.xlu2 %238 }
  0x96   : > { %v241_v37 = vsel %vm232_vm1, %v231_v27, %v239_v33 }
  0x9c   : > { %v219_v35 = vpop.permute.xlu1 %218  ;;  %v217_v36 = vpop.permute.xlu0 %216 }
  0x9d   : > { %v221_v38 = vsel %vm220_vm2, %v217_v36, %v219_v35  ;;  %v224_v46 = vsel %vm220_vm2, %v211_v31, %v217_v36  ;;  %v1799_v10 = vpop.permute.xlu2 %386  ;;  %v275_v35 = vperm.slane %v1706_v28, 2  ;;  %v1845_v36 = vperm.slane %v274_v34, 0 }
  0x9e   : > { %v1719_v39 = vsel %vm249_vm3, %v241_v37, %v221_v38  ;;  %v1791_v8 = vsel %vm595_vm7, %v221_v38, %v241_v37 }
  0x9f   : > { %v329_v40 = vperm.slane %v1719_v39, 0  ;;  %v349_v41 = vperm.slane %v1719_v39, 2  ;;  %253 = vrot.lane.b32.xlu0 %v1719_v39, %s1561_s14  ;;  %v339_v54 = vperm.slane %v1719_v39, 1  ;;  %v1847_v37 = vperm.slane %v275_v35, 0 }
  0xa0   : > { %vm278_vm10 = vcmp.eq.s32.totalorder %v1845_v36, 1 }
  0xa1   : > { %v1727_v43 = vmul.f32 %v329_v40, %v326_v22  ;;  %v1729_v44 = vmul.f32 %v349_v41, %v346_v24  ;;  %vm279_vm11 = vcmp.eq.s32.totalorder %v1847_v37, 1 }
  0xa4   : > { %v229_v45 = vpop.permute.xlu1 %228  ;;  %v305_v13 = vpop.permute.xlu0 %304 }
  0xa5   : > { %v233_v47 = vsel %vm232_vm1, %v229_v45, %v231_v27  ;;  %v1806_v11 = vpop.permute.xlu2 %417 }
  0xa6   : > { %v1736_v48 = vsel %vm248_vm4, %v233_v47, %v224_v46  ;;  %v1771_v62 = vsel %vm594_vm6, %v224_v46, %v233_v47 }
  0xa7   : > { %v328_v49 = vperm.slane %v1736_v48, 0  ;;  %v348_v50 = vperm.slane %v1736_v48, 2  ;;  %266 = vrot.lane.b32.xlu0 %v1719_v39, %s1562_s20  ;;  %264 = vrot.lane.b32.xlu2 %v1736_v48, %s1562_s20  ;;  %v338_v53 = vperm.slane %v1736_v48, 1 }
  0xa8   : > { %257 = vrot.lane.b32.xlu1 %v1736_v48, %s1561_s14 }
  0xa9   : > { %v1746_v51 = vmul.f32 %v328_v49, %v326_v22  ;;  %v1748_v52 = vmul.f32 %v348_v50, %v346_v24  ;;  %v366_v49 = vperm.slane %v1757_v58, 0  ;;  %v367_v50 = vperm.slane %v1757_v58, 2 }
  0xac   : > { %v336_v55 = vpop.permute.xlu1 %335 }
  0xad   : > { %v1752_v56 = vmul.f32 %v338_v53, %v336_v55  ;;  %v1754_v57 = vmul.f32 %v339_v54, %v336_v55  ;;  %v1812_v14 = vpop.permute.xlu2 %434  ;;  %v1818_v16 = vpop.permute.xlu0 %355 }
  0xaf   : > { %506 = vperm.xlu0 %1441, %v202_v23   ;;  %534 = vperm.xlu2 %1443, %v202_v23  }
  0xb0   : > { %520 = vperm.xlu1 %1442, %v202_v23  }
  0xb5   : > { %v1809_v12 = vpop.permute.xlu1 %376  ;;  %v1820_v17 = vpop.permute.xlu2 %406 }
  0xb7   : > { %1446 = vset.pattern.permute.xlu0 %v2364_v3  ;;  %1445 = vset.pattern.permute.xlu2 %v2368_v2 }
  0xb8   : > { %1444 = vset.pattern.permute.xlu1 %v2362_v1  ;;  %571 = vperm.xlu0 %1446, %v205_v60  }
  0xb9   : > { %561 = vperm.xlu2 %1445, %v205_v60   ;;  %551 = vperm.xlu1 %1444, %v205_v60  }
  0xbc   : > { %v1826_v19 = vpop.permute.xlu0 %423 }
  0xbe   : > { %v1814_v15 = vpop.permute.xlu1 %396  ;;  %v1828_v20 = vpop.permute.xlu2 %471 }
  0xc0   : > { %1447 = vset.pattern.permute.xlu0 %v2366_v6 }
  0xc1   : > { %603 = vrot.lane.b32.xlu2 %v1771_v62, %s1561_s14  ;;  %609 = vrot.lane.b32.xlu1 %v1771_v62, %s1562_s20 }
  0xc2   : > { %581 = vperm.xlu0 %1447, %v205_v60  }
  0xc4   : > { %v1833_v23 = vpop.permute.xlu0 %436 }
  0xc6   : > { %v1824_v18 = vpop.permute.xlu1 %425 }
  0xc7   : > { %v1835_v24 = vpop.permute.xlu2 %492 }
  0xc9   : > { %632 = vperm.xlu2 %1445, %v200_v0   ;;  %622 = vperm.xlu1 %1444, %v200_v0  }
  0xca   : > { %1450 = vset.pattern.permute.xlu0 %v2362_v1 }
  0xcb   : > { %663 = vperm.xlu0 %1450, %v203_v5  }
  0xcc   : > { %v1839_v27 = vpop.permute.xlu0 %451 }
  0xce   : > { %v1831_v22 = vpop.permute.xlu1 %443 }
  0xd1   : > { %611 = vrot.lane.b32.xlu2 %v1791_v8, %s1562_s20  ;;  %1448 = vset.pattern.permute.xlu1 %v2364_v3 }
  0xd2   : > { %642 = vperm.xlu1 %1448, %v200_v0   ;;  %1449 = vset.pattern.permute.xlu2 %v2366_v6 }
  0xd3   : > { %1455 = vset.pattern.permute.xlu0 %v2368_v2 }
  0xd4   : > { %716 = vperm.xlu0 %1455, %v206_v9  }
  0xd6   : > { %v1837_v26 = vpop.permute.xlu1 %461 }
  0xd9   : > { %652 = vperm.xlu2 %1449, %v200_v0  }
  0xda   : > { %599 = vrot.lane.b32.xlu1 %v1791_v8, %s1561_s14 }
  0xdb   : > { %1451 = vset.pattern.permute.xlu1 %v2368_v2 }
  0xdc   : > { %1459 = vset.pattern.permute.xlu0 %v2366_v6 }
  0xdf   : > { %v1841_v33 = vpop.permute.xlu1 %481 }
  0xe1   : > { %1452 = vset.pattern.permute.xlu2 %v2364_v3 }
  0xe2   : > { %683 = vperm.xlu2 %1452, %v203_v5   ;;  %673 = vperm.xlu1 %1451, %v203_v5  }
  0xea   : > { %1453 = vset.pattern.permute.xlu1 %v2366_v6  ;;  %1454 = vset.pattern.permute.xlu2 %v2362_v1 }
  0xeb   : > { %693 = vperm.xlu1 %1453, %v203_v5   ;;  %706 = vperm.xlu2 %1454, %v206_v9  }
  0xf3   : > { %1456 = vset.pattern.permute.xlu1 %v2364_v3  ;;  %1457 = vset.pattern.permute.xlu2 %v2366_v6 }
  0xf4   : > { %726 = vperm.xlu1 %1456, %v206_v9   ;;  %736 = vperm.xlu2 %1457, %v206_v9  }
  0xfc   : > { %1458 = vset.pattern.permute.xlu2 %v2368_v2 }
 0x101   : > { %v265_v30 = vpop.permute.xlu2 %264 }
 0x109   : > { %v1849_v38 = vpop.permute.xlu2 %534 }
 0x111   : > { %v254_v31 = vpop.permute.xlu0 %253 }
 0x113   : > { %v1871_v61 = vpop.permute.xlu2 %561 }
 0x119   : > { %v267_v40 = vpop.permute.xlu0 %266 }
 0x11a   : > { %v269_v41 = vsel %vm268_vm8, %v265_v30, %v267_v40  ;;  %v273_v45 = vsel %vm268_vm8, %v267_v40, %v265_v30  ;;  %v258_v46 = vpop.permute.xlu1 %257  ;;  %v1867_v40 = vperm.slane %v366_v49, 0 }
 0x11b   : > { %v260_v28 = vsel %vm259_vm9, %v258_v46, %v254_v31  ;;  %v263_v47 = vsel %vm259_vm9, %v254_v31, %v258_v46  ;;  %v1869_v46 = vperm.slane %v367_v50, 0 }
 0x11c   : > { %v280_v53 = vsel %vm278_vm10, %v269_v41, %v263_v47  ;;  %v281_v54 = vsel %vm279_vm11, %v273_v45, %v260_v28  ;;  %vm370_vm12 = vcmp.eq.s32.totalorder %v1867_v40, 1 }
 0x11d   : > { %v287_v55 = vperm.slane %v280_v53, 0  ;;  %v288_v59 = vperm.slane %v281_v54, 0  ;;  %v297_v60 = vperm.slane %v280_v53, 1  ;;  %v298_v63 = vperm.slane %v281_v54, 1 }
 0x11e   : > { %v307_v0 = vperm.slane %v280_v53, 2  ;;  %v308_v5 = vperm.slane %v281_v54, 2  ;;  %v317_v9 = vperm.slane %v280_v53, 3  ;;  %v318_v30 = vperm.slane %v281_v54, 3 }
 0x11f   : > { %v289_v31 = vmul.f32 %v287_v55, %v1700_v25  ;;  %v290_v34 = vmul.f32 %v288_v59, %v1700_v25  ;;  %v299_v58 = vmul.f32 %v297_v60, %v1693_v21  ;;  %v300_v35 = vmul.f32 %v298_v63, %v1693_v21 }
 0x120   : > { %v309_v6 = vmul.f32 %v307_v0, %v305_v13  ;;  %v310_v2 = vmul.f32 %v308_v5, %v305_v13  ;;  %v319_v25 = vmul.f32 %v317_v9, %v1708_v29  ;;  %v320_v59 = vmul.f32 %v318_v30, %v1708_v29  ;;  %v1923_v0 = vpop.permute.xlu2 %603 }
 0x121   : > { %v301_v1 = vadd.f32 %v299_v58, %v289_v31  ;;  %v302_v3 = vadd.f32 %v300_v35, %v290_v34  ;;  %vm371_vm13 = vcmp.eq.s32.totalorder %v1869_v46, 1  ;;  %v372_v50 = vsel %vm370_vm12, %v263_v47, %v269_v41 }
 0x122   : > { %v1873_v53 = vpop.permute.xlu1 %520  ;;  %v373_v13 = vsel %vm371_vm13, %v260_v28, %v273_v45  ;;  %v358_v60 = vperm.slane %v1736_v48, 3  ;;  %v1895_v29 = vsel %vm259_vm9, %v1806_v11, %v1826_v19  ;;  %v1900_v48 = vsel %vm268_vm8, %v1812_v14, %v1833_v23 }
 0x123   : > { %v311_v54 = vadd.f32 %v309_v6, %v301_v1  ;;  %v312_v55 = vadd.f32 %v310_v2, %v302_v3  ;;  %v359_v1 = vperm.slane %v1719_v39, 3  ;;  %v1890_v6 = vsel %vm259_vm9, %v1826_v19, %v1824_v18 }
 0x124   : > { %v1905_v39 = vsel %vm268_vm8, %v1833_v23, %v1831_v22  ;;  %v379_v18 = vperm.slane %v372_v50, 0  ;;  %v380_v41 = vperm.slane %v373_v13, 0  ;;  %v389_v45 = vperm.slane %v372_v50, 1 }
 0x125   : > { %v321_v21 = vadd.f32 %v319_v25, %v311_v54  ;;  %v322_v49 = vadd.f32 %v320_v59, %v312_v55  ;;  %v390_v28 = vperm.slane %v373_v13, 1  ;;  %v360_v11 = vmul.f32 %v358_v60, %v1818_v16 }
 0x126   : > { %v361_v19 = vmul.f32 %v359_v1, %v1818_v16  ;;  %v399_v22 = vperm.slane %v372_v50, 2  ;;  %v400_v23 = vperm.slane %v373_v13, 2  ;;  %v382_v5 = vmul.f32 %v380_v41, %v1809_v12 }
 0x127   : > { %v332_v2 = vadd.f32 %v1746_v51, %v321_v21  ;;  %v333_v3 = vadd.f32 %v1727_v43, %v322_v49  ;;  %v391_v9 = vmul.f32 %v389_v45, %v1799_v10  ;;  %v392_v30 = vmul.f32 %v390_v28, %v1799_v10 }
 0x128   : > { %v409_v58 = vperm.slane %v372_v50, 3  ;;  %v410_v35 = vperm.slane %v373_v13, 3  ;;  %v401_v21 = vmul.f32 %v399_v22, %v1814_v15  ;;  %v402_v49 = vmul.f32 %v400_v23, %v1814_v15  ;;  %v1943_v23 = vpop.permute.xlu2 %632 }
 0x129   : > { %v342_v43 = vadd.f32 %v1752_v56, %v332_v2  ;;  %v343_v51 = vadd.f32 %v1754_v57, %v333_v3  ;;  %v447_v56 = vsel %vm278_vm10, %v1900_v48, %v1895_v29  ;;  %v448_v57 = vsel %vm279_vm11, %v1905_v39, %v1890_v6 }
 0x12a   : > { %v454_v54 = vperm.slane %v447_v56, 0  ;;  %v455_v55 = vperm.slane %v448_v57, 0  ;;  %v464_v60 = vperm.slane %v447_v56, 1  ;;  %v465_v1 = vperm.slane %v448_v57, 1 }
 0x12b   : > { %v352_v14 = vadd.f32 %v1748_v52, %v342_v43  ;;  %v353_v47 = vadd.f32 %v1729_v44, %v343_v51  ;;  %v1913_v63 = vpop.permute.xlu1 %551  ;;  %v381_v44 = vmul.f32 %v379_v18, %v1809_v12  ;;  %v474_v2 = vperm.slane %v447_v56, 2 }
 0x12c   : > { %v475_v12 = vperm.slane %v448_v57, 2  ;;  %v411_v10 = vmul.f32 %v409_v58, %v1820_v17  ;;  %v412_v51 = vmul.f32 %v410_v35, %v1820_v17  ;;  %v456_v13 = vmul.f32 %v454_v54, %v1839_v27 }
 0x12d   : > { %v362_v16 = vadd.f32 %v360_v11, %v352_v14  ;;  %v363_v52 = vadd.f32 %v361_v19, %v353_v47  ;;  %v457_v18 = vmul.f32 %v455_v55, %v1839_v27  ;;  %v495_v41 = vperm.slane %v1647_v4, 0 }
 0x12e   : > { %v496_v15 = vperm.slane %v1647_v4, 4  ;;  %v509_v11 = vperm.slane %v1647_v4, 1  ;;  %v510_v19 = vperm.slane %v1647_v4, 5  ;;  %v476_v14 = vmul.f32 %v474_v2, %v1828_v20 }
 0x12f   : > { %v383_v31 = vadd.f32 %v381_v44, %v362_v16  ;;  %v384_v34 = vadd.f32 %v382_v5, %v363_v52  ;;  %v477_v17 = vmul.f32 %v475_v12, %v1828_v20  ;;  %v484_v47 = vperm.slane %v447_v56, 3  ;;  %v507_v52 = vpop.permute.xlu0 %506 }
 0x130   : > { %v485_v22 = vperm.slane %v448_v57, 3  ;;  %v466_v27 = vmul.f32 %v464_v60, %v1837_v26  ;;  %v467_v16 = vmul.f32 %v465_v1, %v1837_v26  ;;  %v513_v58 = vperm.slane %v509_v11, 1 }
 0x131   : > { %v393_v25 = vadd.f32 %v391_v9, %v383_v31  ;;  %v394_v59 = vadd.f32 %v392_v30, %v384_v34  ;;  %v499_v9 = vperm.slane %v495_v41, 0  ;;  %v500_v30 = vperm.slane %v496_v15, 0  ;;  %v612_v15 = vpop.permute.xlu2 %611 }
 0x132   : > { %v523_v31 = vperm.slane %v1647_v4, 2  ;;  %v524_v34 = vperm.slane %v1647_v4, 6  ;;  %v514_v35 = vperm.slane %v510_v19, 1  ;;  %v486_v57 = vmul.f32 %v484_v47, %v1841_v33 }
 0x133   : > { %v403_v3 = vadd.f32 %v401_v21, %v393_v25  ;;  %v404_v43 = vadd.f32 %v402_v49, %v394_v59  ;;  %v1933_v50 = vpop.permute.xlu1 %609  ;;  %v487_v54 = vmul.f32 %v485_v22, %v1841_v33  ;;  %v537_v55 = vperm.slane %v1647_v4, 3 }
 0x134   : > { %v538_v26 = vperm.slane %v1647_v4, 7  ;;  %v501_v49 = vmul.f32 %v499_v9, %v1835_v24  ;;  %v502_v60 = vmul.f32 %v500_v30, %v1835_v24  ;;  %v527_v1 = vperm.slane %v523_v31, 2 }
 0x135   : > { %v413_v45 = vadd.f32 %v411_v10, %v403_v3  ;;  %v414_v28 = vadd.f32 %v412_v51, %v404_v43  ;;  %v528_v2 = vperm.slane %v524_v34, 2  ;;  %v515_v43 = vmul.f32 %v513_v58, %v507_v52 }
 0x136   : > { %v516_v10 = vmul.f32 %v514_v35, %v507_v52  ;;  %v547_v33 = vsel %vm370_vm12, %v1895_v29, %v1900_v48  ;;  %v548_v51 = vsel %vm371_vm13, %v1890_v6, %v1905_v39 }
 0x137   : > { %v458_v44 = vadd.f32 %v456_v13, %v413_v45  ;;  %v459_v5 = vadd.f32 %v457_v18, %v414_v28  ;;  %v541_v13 = vperm.slane %v537_v55, 3  ;;  %v542_v18 = vperm.slane %v538_v26, 3 }
 0x138   : > { %v529_v45 = vmul.f32 %v527_v1, %v1873_v53  ;;  %v530_v28 = vmul.f32 %v528_v2, %v1873_v53  ;;  %v555_v47 = vperm.slane %v548_v51, 0  ;;  %v564_v39 = vperm.slane %v547_v33, 1 }
 0x139   : > { %v468_v20 = vadd.f32 %v466_v27, %v458_v44  ;;  %v469_v56 = vadd.f32 %v467_v16, %v459_v5  ;;  %v543_v29 = vmul.f32 %v541_v13, %v1849_v38  ;;  %v544_v48 = vmul.f32 %v542_v18, %v1849_v38 }
 0x13a   : > { %v565_v27 = vperm.slane %v548_v51, 1  ;;  %v557_v53 = vmul.f32 %v555_v47, %v1913_v63  ;;  %v566_v9 = vmul.f32 %v564_v39, %v1871_v61  ;;  %v574_v58 = vperm.slane %v547_v33, 2 }
 0x13b   : > { %v478_v25 = vadd.f32 %v476_v14, %v468_v20  ;;  %v479_v59 = vadd.f32 %v477_v17, %v469_v56  ;;  %v1953_v21 = vpop.permute.xlu1 %622  ;;  %v572_v14 = vpop.permute.xlu0 %571  ;;  %v554_v17 = vperm.slane %v547_v33, 0  ;;  %v575_v35 = vperm.slane %v548_v51, 2 }
 0x13c   : > { %v567_v30 = vmul.f32 %v565_v27, %v1871_v61  ;;  %v576_v56 = vmul.f32 %v574_v58, %v572_v14  ;;  %v617_v61 = vsel %vm268_vm8, %v612_v15, %v1933_v50  ;;  %v677_v58 = vperm.slane %v1791_v8, 1 }
 0x13d   : > { %v488_v12 = vadd.f32 %v486_v57, %v478_v25  ;;  %v489_v3 = vadd.f32 %v487_v54, %v479_v59  ;;  %v556_v5 = vmul.f32 %v554_v17, %v1913_v63  ;;  %v577_v57 = vmul.f32 %v575_v35, %v572_v14  ;;  %v653_v54 = vpop.permute.xlu2 %652 }
 0x13e   : > { %v584_v59 = vperm.slane %v547_v33, 3  ;;  %v613_v63 = vsel %vm268_vm8, %v1933_v50, %v612_v15 }
 0x13f   : > { %v503_v41 = vadd.f32 %v501_v49, %v488_v12  ;;  %v504_v24 = vadd.f32 %v502_v60, %v489_v3  ;;  %v585_v49 = vperm.slane %v548_v51, 3 }
 0x141   : > { %v517_v11 = vadd.f32 %v515_v43, %v503_v41  ;;  %v518_v19 = vadd.f32 %v516_v10, %v504_v24  ;;  %v1988_v24 = vld [vmem:[%s2359_s2] sm:$0xf] }
 0x142   : > { %864 = vperm.xlu0 %1459, %v1988_v24  }
 0x143   : > { %v531_v22 = vadd.f32 %v529_v45, %v517_v11  ;;  %v532_v6 = vadd.f32 %v530_v28, %v518_v19  ;;  %v582_v55 = vpop.permute.xlu0 %581 }
 0x144   : > { %v643_v16 = vpop.permute.xlu1 %642  ;;  %v586_v12 = vmul.f32 %v584_v59, %v582_v55  ;;  %v587_v3 = vmul.f32 %v585_v49, %v582_v55 }
 0x145   : > { %v545_v52 = vadd.f32 %v543_v29, %v531_v22  ;;  %v546_v44 = vadd.f32 %v544_v48, %v532_v6  ;;  %v684_v48 = vpop.permute.xlu2 %683 }
 0x147   : > { %v558_v31 = vadd.f32 %v556_v5, %v545_v52  ;;  %v559_v34 = vadd.f32 %v557_v53, %v546_v44  ;;  %v667_v44 = vperm.slane %v1791_v8, 0 }
 0x149   : > { %v568_v38 = vadd.f32 %v566_v9, %v558_v31  ;;  %v569_v20 = vadd.f32 %v567_v30, %v559_v34  ;;  %v676_v34 = vperm.slane %v1771_v62, 1 }
 0x14b   : > { %v578_v26 = vadd.f32 %v576_v56, %v568_v38  ;;  %v579_v25 = vadd.f32 %v577_v57, %v569_v20  ;;  %v664_v5 = vpop.permute.xlu0 %663  ;;  %v687_v56 = vperm.slane %v1791_v8, 2 }
 0x14c   : > { %v600_v60 = vpop.permute.xlu1 %599  ;;  %v669_v35 = vmul.f32 %v667_v44, %v664_v5 }
 0x14d   : > { %v605_v1 = vsel %vm259_vm9, %v1923_v0, %v600_v60  ;;  %v608_v2 = vsel %vm259_vm9, %v600_v60, %v1923_v0  ;;  %v588_v41 = vadd.f32 %v586_v12, %v578_v26  ;;  %v589_v50 = vadd.f32 %v587_v3, %v579_v25  ;;  %v707_v12 = vpop.permute.xlu2 %706 }
 0x14e   : > { %v618_v43 = vsel %vm278_vm10, %v613_v63, %v608_v2  ;;  %v619_v10 = vsel %vm279_vm11, %v617_v61, %v605_v1  ;;  %v702_v57 = vsel %vm370_vm12, %v608_v2, %v613_v63  ;;  %v703_v55 = vsel %vm371_vm13, %v605_v1, %v617_v61 }
 0x14f   : > { %v625_v33 = vperm.slane %v618_v43, 0  ;;  %v626_v51 = vperm.slane %v619_v10, 0  ;;  %v635_v13 = vperm.slane %v618_v43, 1  ;;  %v636_v18 = vperm.slane %v619_v10, 1 }
 0x150   : > { %v645_v45 = vperm.slane %v618_v43, 2  ;;  %v646_v28 = vperm.slane %v619_v10, 2  ;;  %v655_v11 = vperm.slane %v618_v43, 3  ;;  %v656_v19 = vperm.slane %v619_v10, 3 }
 0x151   : > { %v627_v0 = vmul.f32 %v625_v33, %v1953_v21  ;;  %v628_v15 = vmul.f32 %v626_v51, %v1953_v21  ;;  %v637_v47 = vmul.f32 %v635_v13, %v1943_v23  ;;  %v638_v29 = vmul.f32 %v636_v18, %v1943_v23 }
 0x152   : > { %v647_v6 = vmul.f32 %v645_v45, %v643_v16  ;;  %v648_v39 = vmul.f32 %v646_v28, %v643_v16  ;;  %v666_v21 = vperm.slane %v1771_v62, 0  ;;  %v657_v30 = vmul.f32 %v655_v11, %v653_v54 }
 0x153   : > { %v629_v14 = vadd.f32 %v627_v0, %v588_v41  ;;  %v630_v17 = vadd.f32 %v628_v15, %v589_v50  ;;  %v658_v31 = vmul.f32 %v656_v19, %v653_v54  ;;  %v686_v16 = vperm.slane %v1771_v62, 2  ;;  %v717_v11 = vpop.permute.xlu0 %716 }
 0x154   : > { %v674_v22 = vpop.permute.xlu1 %673  ;;  %v668_v23 = vmul.f32 %v666_v21, %v664_v5  ;;  %v689_v60 = vmul.f32 %v687_v56, %v684_v48  ;;  %v696_v3 = vperm.slane %v1771_v62, 3  ;;  %v697_v43 = vperm.slane %v1791_v8, 3 }
 0x155   : > { %v639_v27 = vadd.f32 %v637_v47, %v629_v14  ;;  %v640_v52 = vadd.f32 %v638_v29, %v630_v17  ;;  %v678_v25 = vmul.f32 %v676_v34, %v674_v22  ;;  %v679_v59 = vmul.f32 %v677_v58, %v674_v22  ;;  %v737_v22 = vpop.permute.xlu2 %736 }
 0x156   : > { %v688_v49 = vmul.f32 %v686_v16, %v684_v48  ;;  %v709_v10 = vperm.slane %v702_v57, 0  ;;  %v710_v33 = vperm.slane %v703_v55, 0  ;;  %v719_v1 = vperm.slane %v702_v57, 1 }
 0x157   : > { %v649_v53 = vadd.f32 %v647_v6, %v639_v27  ;;  %v650_v9 = vadd.f32 %v648_v39, %v640_v52  ;;  %v720_v50 = vperm.slane %v703_v55, 1  ;;  %v739_v14 = vperm.slane %v702_v57, 3 }
 0x158   : > { %v711_v0 = vmul.f32 %v709_v10, %v707_v12  ;;  %v712_v15 = vmul.f32 %v710_v33, %v707_v12  ;;  %v740_v8 = vperm.slane %v703_v55, 3  ;;  %v721_v17 = vmul.f32 %v719_v1, %v717_v11 }
 0x159   : > { %v659_v38 = vadd.f32 %v657_v30, %v649_v53  ;;  %v660_v20 = vadd.f32 %v658_v31, %v650_v9  ;;  %v722_v47 = vmul.f32 %v720_v50, %v717_v11  ;;  %v729_v29 = vperm.slane %v702_v57, 2 }
 0x15a   : > { %v730_v48 = vperm.slane %v703_v55, 2  ;;  %v741_v44 = vmul.f32 %v739_v14, %v737_v22  ;;  %v742_v5 = vmul.f32 %v740_v8, %v737_v22  ;;  %v2375_v56 = vmov 3  }
 0x15b   : > { %v670_v26 = vadd.f32 %v668_v23, %v659_v38  ;;  %v671_v54 = vadd.f32 %v669_v35, %v660_v20  ;;  %v2374_v35 = vmov 1   ;;  %v782_v38 = vld [vmem:[%s2359_s2 + $0xc] sm:$0xf]  ;;  %v2377_v12 = vmov 0  }
 0x15d   : > { %v680_v51 = vadd.f32 %v678_v25, %v670_v26  ;;  %v681_v13 = vadd.f32 %v679_v59, %v671_v54  ;;  %v694_v18 = vpop.permute.xlu1 %693 }
 0x15e   : > { %v698_v63 = vmul.f32 %v696_v3, %v694_v18  ;;  %v699_v2 = vmul.f32 %v697_v43, %v694_v18  ;;  %v2025_v3 = vld [vmem:[%s2359_s2 + $0x18] sm:$0xf]  ;;  %v2034_v43 = vld [vmem:[%s2359_s2 + $0x4] sm:$0xf] }
 0x15f   : > { %v690_v41 = vadd.f32 %v688_v49, %v680_v51  ;;  %v691_v61 = vadd.f32 %v689_v60, %v681_v13  ;;  %v2376_v60 = vmov 2  }
 0x161   : > { %v700_v45 = vadd.f32 %v698_v63, %v690_v41  ;;  %v701_v28 = vadd.f32 %v699_v2, %v691_v61 }
 0x163   : > { %v713_v19 = vadd.f32 %v711_v0, %v700_v45  ;;  %v714_v62 = vadd.f32 %v712_v15, %v701_v28 }
 0x165   : > { %v723_v39 = vadd.f32 %v721_v17, %v713_v19  ;;  %v724_v27 = vadd.f32 %v722_v47, %v714_v62 }
 0x166   : > { %v727_v6 = vpop.permute.xlu1 %726 }
 0x167   : > { %v731_v52 = vmul.f32 %v729_v29, %v727_v6  ;;  %v732_v21 = vmul.f32 %v730_v48, %v727_v6 }
 0x169   : > { %v733_v53 = vadd.f32 %v731_v52, %v723_v39  ;;  %v734_v9 = vadd.f32 %v732_v21, %v724_v27 }
 0x16b   : > { %v743_v30 = vadd.f32 %v741_v44, %v733_v53  ;;  %v744_v31 = vadd.f32 %v742_v5, %v734_v9  ;;  %v786_v5 = vld [vmem:[%s2359_s2 + $0x1c] sm:$0xf]  ;;  %v781_v53 = vld [vmem:[%s2359_s2 + $0x8] sm:$0xf] }
 0x16d   : > { %v746_v34 = vsel %vm745_vm14, %v743_v30, 0.0  ;;  %v747_v58 = vsel %vm745_vm14, %v744_v31, 0.0 }
 0x16e   : > { %v748_v23 = vadd.f32 %v747_v58, %v746_v34 }
 0x170   : > { %749 = vadd.xlane.f32.xlu1 %v748_v23 }
 0x189   : > { %854 = vperm.xlu1 %1456, %v1988_v24  }
 0x191   : > { %1461 = vset.pattern.permute.xlu1 %v2374_v35 }
 0x192   : > { %885 = vperm.xlu1 %1461, %v782_v38  }
 0x19a   : > { %1463 = vset.pattern.permute.xlu1 %v2375_v56 }
 0x19b   : > { %905 = vperm.xlu1 %1463, %v782_v38  }
 0x1a3   : > { %1465 = vset.pattern.permute.xlu1 %v2376_v60 }
 0x1a4   : > { %938 = vperm.xlu1 %1465, %v2025_v3  }
 0x1ac   : > { %1466 = vset.pattern.permute.xlu1 %v2375_v56 }
 0x1ad   : > { %948 = vperm.xlu1 %1466, %v2025_v3  }
 0x1b4   : > { %v2064_v19 = vpop.permute.xlu0 %864 }
 0x1b5   : > { %1467 = vset.pattern.permute.xlu1 %v2376_v60 }
 0x1b6   : > { %999 = vperm.xlu1 %1467, %v2034_v43  }
 0x1be   : > { %1470 = vset.pattern.permute.xlu1 %v2374_v35 }
 0x1e3   : > { %v750_v20 = vpop.xlane.xlu1 %749 }
 0x1e4   : > { %v751_v16 = vmul.f32 0.00390625, %v750_v20  ;;  %v787_v20 = vld [vmem:[%s2359_s2 + $0x20] sm:$0xf] }
 0x1e6   : > { %v752_v57 = vsub.f32 %v743_v30, %v751_v16  ;;  %v753_v55 = vsub.f32 %v744_v31, %v751_v16 }
 0x1e8   : > { %v754_v26 = vmul.f32 %v752_v57, %v752_v57  ;;  %v755_v54 = vmul.f32 %v753_v55, %v753_v55 }
 0x1ea   : > { %v756_v25 = vsel %vm745_vm14, %v754_v26, 0.0  ;;  %v757_v59 = vsel %vm745_vm14, %v755_v54, 0.0 }
 0x1eb   : > { %v758_v49 = vadd.f32 %v757_v59, %v756_v25 }
 0x1ed   : > { %759 = vadd.xlane.f32.xlu2 %v758_v49 }
 0x1fb   : > { %v2124_v58 = vpop.permute.xlu1 %854 }
 0x204   : > { %v2136_v23 = vpop.permute.xlu1 %885 }
 0x205   : > { %844 = vperm.xlu2 %1458, %v1988_v24  }
 0x20d   : > { %1460 = vset.pattern.permute.xlu2 %v2377_v12 }
 0x20e   : > { %875 = vperm.xlu2 %1460, %v782_v38  }
 0x216   : > { %1462 = vset.pattern.permute.xlu2 %v2376_v60 }
 0x217   : > { %895 = vperm.xlu2 %1462, %v782_v38   ;;  %v784_v38 = vld [vmem:[%s2359_s2 + $0x14] sm:$0xf] }
 0x21f   : > { %1464 = vset.pattern.permute.xlu2 %v2374_v35 }
 0x220   : > { %928 = vperm.xlu2 %1464, %v2025_v3  }
 0x228   : > { %989 = vperm.xlu2 %1464, %v2034_v43  }
 0x230   : > { %1469 = vset.pattern.permute.xlu2 %v2377_v12 }
 0x260   : > { %v760_v10 = vpop.xlane.xlu2 %759 }
 0x261   : > { %v761_v33 = vmul.f32 0.00390625, %v760_v10 }
 0x263   : > { %v762_v51 = vadd.f32 1e-05, %v761_v33 }
 0x265   : > { %1487 = vrsqrt.f32 %v762_v51  ;;  %vm769_vm0 = vweird.f32 %v762_v51 }
 0x268   : > { %v2066_v17 = vpop.permute.xlu2 %844 }
 0x26b   : > { %v1488_v13 = vpop.eup %1487 }
 0x26c   : > { %v764_v18 = vmul.f32 %v1488_v13, %v762_v51  ;;  %vm770_vm15 = vweird.f32 %v1488_v13 }
 0x26d   : > { %vm771_vm5 = vmor %vm769_vm0, %vm770_vm15 }
 0x26e   : > { %v765_v63 = vmul.f32 %v1488_v13, %v764_v18 }
 0x270   : > { %v766_v2 = vmul.f32 0.5, %v765_v63  ;;  %v876_v21 = vpop.permute.xlu2 %875 }
 0x272   : > { %v767_v41 = vsub.f32 1.5, %v766_v2 }
 0x274   : > { %v768_v61 = vmul.f32 %v1488_v13, %v767_v41 }
 0x276   : > { %v772_v1 = vsel %vm771_vm5, %v1488_v13, %v768_v61 }
 0x277   : > { %v773_v50 = vmul.f32 %v772_v1, %v752_v57  ;;  %v774_v0 = vmul.f32 %v772_v1, %v753_v55  ;;  %v2147_v57 = vpop.permute.xlu1 %905 }
 0x278   : > { %v2118_v30 = vpop.permute.xlu2 %895 }
 0x279   : > { %v775_v15 = vmul.f32 0.1, %v773_v50  ;;  %v776_v45 = vmul.f32 0.1, %v774_v0 }
 0x27b   : > { %v2041_v28 = vmax.f32 %v773_v50, %v775_v15  ;;  %v2043_v11 = vmax.f32 %v774_v0, %v776_v45 }
 0x27d   : > { %957 = vrot.lane.b32.xlu2 %v2043_v11, %s1561_s14  ;;  %789 = vrot.lane.b32.xlu0 %v2043_v11, %s1559_s10 }
 0x27e   : > { %960 = vrot.lane.b32.xlu1 %v2041_v28, %s1561_s14 }
 0x27f   : > { %v2154_v26 = vpop.permute.xlu1 %938 }
 0x280   : > { %v2134_v7 = vpop.permute.xlu2 %928 }
 0x285   : > { %968 = vrot.lane.b32.xlu2 %v2043_v11, %s1562_s20  ;;  %793 = vrot.lane.b32.xlu0 %v2041_v28, %s1559_s10 }
 0x287   : > { %v2161_v25 = vpop.permute.xlu1 %948 }
 0x288   : > { %v2145_v16 = vpop.permute.xlu2 %989 }
 0x28d   : > { %799 = vrot.lane.b32.xlu0 %v2041_v28, %s1560_s11 }
 0x295   : > { %801 = vrot.lane.b32.xlu0 %v2043_v11, %s1560_s11  ;;  %s1303_s11 = sshll.u32 %s1299_s6, 4  ;;  %s1304_s11 = int_to_ptr.hbm [resolvable:$true] %s1303_s11 }
 0x296   : > { %s1505_s8 = sshra.s32 %s1304_s11, 4  ;;  %s1506_s8 = int_to_ptr.hbm [resolvable:$true] %s1505_s8 }
 0x297   : > { %s1507_s9 = scalar_lea.hbm %s1506_s8, 8  ;;  %p1512_p0 = scmp.lt.s32.totalorder %s1506_s8, %s2361_s4 }
 0x298   : > { %p1508_p11 = scmp.ne.s32.totalorder %s1506_s8, %s1507_s9  ;;  %p1513_p1 = scmp.lt.s32.totalorder %s1511_s22, %s1507_s9 }
 0x29a   : > { %p1509_p12 = pnand %p1508_p11, %p1626_p5  ;;  %p1514_p2 = por %p1513_p1, %p1512_p0 }
 0x29c   : > { %p1510_p13 = pneg %p1509_p12 }
 0x29d   : > { %1009 = vperm.xlu0 %1459, %v2034_v43  }
 0x29e   : > { %p1515_p3 = pnand %p1514_p2, %p1510_p13 }
 0x2a5   : > { %1468 = vset.pattern.permute.xlu0 %v2377_v12 }
 0x2a6   : > { %834 = vperm.xlu0 %1468, %v1988_v24  }
 0x2ae   : > { %966 = vrot.lane.b32.xlu0 %v2041_v28, %s1562_s20 }
 0x2d7   : > { %v2152_v55 = vpop.permute.xlu2 %957 }
 0x2df   : > { %v2158_v54 = vpop.permute.xlu2 %968 }
 0x2ef   : > { %v790_v62 = vpop.permute.xlu0 %789 }
 0x2f7   : > { %v794_v14 = vpop.permute.xlu0 %793 }
 0x2f8   : > { %v795_v29 = vsel %vm220_vm2, %v794_v14, %v790_v62  ;;  %v798_v48 = vsel %vm220_vm2, %v790_v62, %v794_v14 }
 0x2ff   : > { %v800_v8 = vpop.permute.xlu0 %799 }
 0x307   : > { %v802_v47 = vpop.permute.xlu0 %801 }
 0x308   : > { %v803_v22 = vsel %vm232_vm1, %v800_v8, %v802_v47  ;;  %v807_v6 = vsel %vm232_vm1, %v802_v47, %v800_v8 }
 0x309   : > { %v2074_v24 = vsel %vm248_vm4, %v803_v22, %v798_v48  ;;  %v2078_v39 = vsel %vm249_vm3, %v807_v6, %v795_v29  ;;  %v2112_v9 = vsel %vm595_vm7, %v795_v29, %v807_v6  ;;  %v2122_v34 = vsel %vm594_vm6, %v798_v48, %v803_v22 }
 0x30a   : > { %v878_v27 = vperm.slane %v2074_v24, 0  ;;  %v879_v52 = vperm.slane %v2078_v39, 0  ;;  %811 = vrot.lane.b32.xlu0 %v2078_v39, %s1561_s14  ;;  %821 = vrot.lane.b32.xlu1 %v2074_v24, %s1562_s20  ;;  %v889_v31 = vperm.slane %v2078_v39, 1 }
 0x30b   : > { %815 = vrot.lane.b32.xlu2 %v2074_v24, %s1561_s14 }
 0x30c   : > { %v2088_v42 = vmul.f32 %v878_v27, %v876_v21  ;;  %v2090_v44 = vmul.f32 %v879_v52, %v876_v21 }
 0x30f   : > { %v2163_v59 = vpop.permute.xlu0 %1009 }
 0x312   : > { %823 = vrot.lane.b32.xlu0 %v2078_v39, %s1562_s20  ;;  %1030 = vperm.xlu1 %1470, %v783_v32  }
 0x313   : > { %1020 = vperm.xlu2 %1469, %v783_v32  }
 0x31a   : > { %918 = vperm.xlu0 %1468, %v2025_v3   ;;  %1472 = vset.pattern.permute.xlu1 %v2375_v56  ;;  %v835_v3 = vpop.permute.xlu0 %834 }
 0x31b   : > { %1471 = vset.pattern.permute.xlu2 %v2376_v60  ;;  %1050 = vperm.xlu1 %1472, %v783_v32  }
 0x31c   : > { %1040 = vperm.xlu2 %1471, %v783_v32  }
 0x322   : > { %979 = vperm.xlu0 %1468, %v2034_v43   ;;  %v967_v10 = vpop.permute.xlu0 %966 }
 0x323   : > { %1474 = vset.pattern.permute.xlu1 %v2376_v60 }
 0x324   : > { %1473 = vset.pattern.permute.xlu2 %v2374_v35  ;;  %1083 = vperm.xlu1 %1474, %v786_v5  }
 0x325   : > { %1073 = vperm.xlu2 %1473, %v786_v5  }
 0x32a   : > { %1063 = vperm.xlu0 %1468, %v786_v5  }
 0x32c   : > { %1475 = vset.pattern.permute.xlu1 %v2375_v56 }
 0x32d   : > { %1138 = vperm.xlu2 %1473, %v781_v53   ;;  %1093 = vperm.xlu1 %1475, %v786_v5  }
 0x332   : > { %1128 = vperm.xlu0 %1468, %v781_v53  }
 0x335   : > { %1105 = vrot.lane.b32.xlu2 %v2112_v9, %s1561_s14  ;;  %1476 = vset.pattern.permute.xlu1 %v2376_v60 }
 0x336   : > { %1148 = vperm.xlu1 %1476, %v781_v53   ;;  %1478 = vset.pattern.permute.xlu2 %v2377_v12 }
 0x33a   : > { %1115 = vrot.lane.b32.xlu0 %v2122_v34, %s1562_s20 }
 0x33b   : > { %1477 = vset.pattern.permute.xlu0 %v2375_v56 }
 0x33d   : > { %1117 = vrot.lane.b32.xlu2 %v2112_v9, %s1562_s20 }
 0x33e   : > { %1109 = vrot.lane.b32.xlu1 %v2122_v34, %s1561_s14  ;;  %s188_s14 = sand.u32 1, %s1545_s16  }
 0x33f   : > { %1479 = vset.pattern.permute.xlu1 %v2374_v35  ;;  %s1367_s20 = sshll.u32 %s188_s14, 3  ;;  %s1288_s19 = scalar_lea.sflag [#allocation3], %s188_s14 }
 0x340   : > { %s190_s7 = scalar_lea.vmem [#allocation2], %s1367_s20 }
 0x341   : > { %s1301_s10 = sshll.u32 %s190_s7, 4  ;;  %s1302_s10 = int_to_ptr.vmem [resolvable:$true] %s1301_s10 }
 0x342   : > { %1158 = vperm.xlu0 %1477, %v781_v53   ;;  %v888_v53 = vperm.slane %v2074_v24, 1 }
 0x345   : > { %1169 = vperm.xlu2 %1478, %v784_v38  }
 0x346   : > { %1179 = vperm.xlu1 %1479, %v784_v38  }
 0x34a   : > { %1482 = vset.pattern.permute.xlu0 %v2377_v12  ;;  %v2165_v12 = vpop.permute.xlu1 %999 }
 0x34b   : > { %1212 = vperm.xlu0 %1482, %v787_v20  }
 0x34d   : > { %1480 = vset.pattern.permute.xlu2 %v2376_v60 }
 0x34e   : > { %1189 = vperm.xlu2 %1480, %v784_v38   ;;  %1481 = vset.pattern.permute.xlu1 %v2375_v56 }
 0x34f   : > { %1199 = vperm.xlu1 %1481, %v784_v38  }
 0x353   : > { %1486 = vset.pattern.permute.xlu0 %v2375_v56 }
 0x356   : > { %1483 = vset.pattern.permute.xlu2 %v2374_v35  ;;  %v2169_v35 = vpop.permute.xlu1 %960 }
 0x357   : > { %1222 = vperm.xlu2 %1483, %v787_v20   ;;  %1484 = vset.pattern.permute.xlu1 %v2376_v60 }
 0x358   : > { %1232 = vperm.xlu1 %1484, %v787_v20  }
 0x35f   : > { %1485 = vset.pattern.permute.xlu2 %v2375_v56 }
 0x360   : > { %1242 = vperm.xlu2 %1485, %v787_v20  }
 0x365   : > { %v816_v49 = vpop.permute.xlu2 %815 }
 0x36d   : > { %v2167_v43 = vpop.permute.xlu2 %1020 }
 0x376   : > { %v2171_v60 = vpop.permute.xlu2 %1040 }
 0x37c   : > { %v812_v33 = vpop.permute.xlu0 %811  ;;  %v822_v51 = vpop.permute.xlu1 %821 }
 0x37d   : > { %v817_v18 = vsel %vm259_vm9, %v816_v49, %v812_v33  ;;  %v820_v63 = vsel %vm259_vm9, %v812_v33, %v816_v49 }
 0x37f   : > { %v2179_v61 = vpop.permute.xlu2 %1073 }
 0x384   : > { %v824_v13 = vpop.permute.xlu0 %823  ;;  %v2173_v56 = vpop.permute.xlu1 %1030 }
 0x385   : > { %v825_v2 = vsel %vm268_vm8, %v822_v51, %v824_v13  ;;  %v829_v41 = vsel %vm268_vm8, %v824_v13, %v822_v51  ;;  %v899_v13 = vperm.slane %v2078_v39, 2 }
 0x386   : > { %v830_v1 = vsel %vm278_vm10, %v825_v2, %v820_v63  ;;  %v831_v50 = vsel %vm279_vm11, %v829_v41, %v817_v18 }
 0x387   : > { %v837_v0 = vperm.slane %v830_v1, 0  ;;  %v838_v15 = vperm.slane %v831_v50, 0  ;;  %v847_v45 = vperm.slane %v830_v1, 1  ;;  %v848_v62 = vperm.slane %v831_v50, 1 }
 0x388   : > { %v857_v14 = vperm.slane %v830_v1, 2  ;;  %v858_v8 = vperm.slane %v831_v50, 2  ;;  %v867_v47 = vperm.slane %v830_v1, 3  ;;  %v868_v29 = vperm.slane %v831_v50, 3 }
 0x389   : > { %v839_v48 = vmul.f32 %v837_v0, %v835_v3  ;;  %v840_v22 = vmul.f32 %v838_v15, %v835_v3  ;;  %v849_v6 = vmul.f32 %v847_v45, %v2066_v17  ;;  %v850_v27 = vmul.f32 %v848_v62, %v2066_v17  ;;  %v2199_v15 = vpop.permute.xlu2 %1138 }
 0x38a   : > { %v859_v32 = vmul.f32 %v857_v14, %v2124_v58  ;;  %v860_v5 = vmul.f32 %v858_v8, %v2124_v58  ;;  %v869_v33 = vmul.f32 %v867_v47, %v2064_v19  ;;  %v870_v3 = vmul.f32 %v868_v29, %v2064_v19 }
 0x38b   : > { %v851_v52 = vadd.f32 %v849_v6, %v839_v48  ;;  %v852_v21 = vadd.f32 %v850_v27, %v840_v22  ;;  %v898_v17 = vperm.slane %v2074_v24, 2  ;;  %v908_v58 = vperm.slane %v2074_v24, 3 }
 0x38c   : > { %v919_v38 = vpop.permute.xlu0 %918  ;;  %v909_v0 = vperm.slane %v2078_v39, 3  ;;  %v890_v45 = vmul.f32 %v888_v53, %v2136_v23  ;;  %v891_v62 = vmul.f32 %v889_v31, %v2136_v23  ;;  %v914_v19 = vsel %vm370_vm12, %v820_v63, %v825_v2 }
 0x38d   : > { %v861_v20 = vadd.f32 %v859_v32, %v851_v52  ;;  %v862_v49 = vadd.f32 %v860_v5, %v852_v21  ;;  %v2193_v51 = vpop.permute.xlu1 %1050  ;;  %v915_v14 = vsel %vm371_vm13, %v817_v18, %v829_v41  ;;  %v900_v24 = vmul.f32 %v898_v17, %v2118_v30 }
 0x38e   : > { %v901_v39 = vmul.f32 %v899_v13, %v2118_v30  ;;  %v910_v22 = vmul.f32 %v908_v58, %v2147_v57  ;;  %v911_v23 = vmul.f32 %v909_v0, %v2147_v57  ;;  %v2215_v63 = vsel %vm268_vm8, %v967_v10, %v2158_v54 }
 0x38f   : > { %v871_v1 = vadd.f32 %v869_v33, %v861_v20  ;;  %v872_v50 = vadd.f32 %v870_v3, %v862_v49  ;;  %v2219_v18 = vsel %vm268_vm8, %v2158_v54, %v967_v10  ;;  %v921_v30 = vperm.slane %v914_v19, 0 }
 0x390   : > { %v922_v27 = vperm.slane %v915_v14, 0  ;;  %v2224_v52 = vsel %vm259_vm9, %v2169_v35, %v2152_v55  ;;  %v965_v57 = vsel %vm259_vm9, %v2152_v55, %v2169_v35  ;;  %v941_v21 = vperm.slane %v914_v19, 2 }
 0x391   : > { %v882_v8 = vadd.f32 %v2088_v42, %v871_v1  ;;  %v883_v47 = vadd.f32 %v2090_v44, %v872_v50  ;;  %v931_v42 = vperm.slane %v914_v19, 1  ;;  %v932_v44 = vperm.slane %v915_v14, 1  ;;  %v2240_v1 = vpop.permute.xlu2 %1105 }
 0x392   : > { %v942_v32 = vperm.slane %v915_v14, 2  ;;  %v923_v53 = vmul.f32 %v921_v30, %v919_v38  ;;  %v924_v31 = vmul.f32 %v922_v27, %v919_v38  ;;  %v975_v20 = vsel %vm278_vm10, %v2215_v63, %v965_v57 }
 0x393   : > { %v892_v29 = vadd.f32 %v890_v45, %v882_v8  ;;  %v893_v48 = vadd.f32 %v891_v62, %v883_v47  ;;  %v976_v49 = vsel %vm279_vm11, %v2219_v18, %v2224_v52  ;;  %v951_v33 = vperm.slane %v914_v19, 3 }
 0x394   : > { %v980_v2 = vpop.permute.xlu0 %979  ;;  %v952_v3 = vperm.slane %v915_v14, 3  ;;  %v933_v17 = vmul.f32 %v931_v42, %v2134_v7  ;;  %v934_v13 = vmul.f32 %v932_v44, %v2134_v7  ;;  %v943_v58 = vmul.f32 %v941_v21, %v2154_v26 }
 0x395   : > { %v902_v41 = vadd.f32 %v900_v24, %v892_v29  ;;  %v903_v6 = vadd.f32 %v901_v39, %v893_v48  ;;  %v944_v0 = vmul.f32 %v942_v32, %v2154_v26  ;;  %v992_v45 = vperm.slane %v975_v20, 1 }
 0x396   : > { %v2229_v54 = vpop.permute.xlu1 %1083  ;;  %v993_v62 = vperm.slane %v976_v49, 1  ;;  %v982_v8 = vperm.slane %v975_v20, 0  ;;  %v983_v47 = vperm.slane %v976_v49, 0  ;;  %v953_v39 = vmul.f32 %v951_v33, %v2161_v25 }
 0x397   : > { %v912_v10 = vadd.f32 %v910_v22, %v902_v41  ;;  %v913_v5 = vadd.f32 %v911_v23, %v903_v6  ;;  %v954_v7 = vmul.f32 %v952_v3, %v2161_v25  ;;  %v1002_v29 = vperm.slane %v975_v20, 2 }
 0x398   : > { %v1003_v48 = vperm.slane %v976_v49, 2  ;;  %v984_v42 = vmul.f32 %v982_v8, %v980_v2  ;;  %v985_v44 = vmul.f32 %v983_v47, %v980_v2  ;;  %v1012_v26 = vperm.slane %v975_v20, 3 }
 0x399   : > { %v925_v55 = vadd.f32 %v923_v53, %v912_v10  ;;  %v926_v35 = vadd.f32 %v924_v31, %v913_v5  ;;  %v1013_v6 = vperm.slane %v976_v49, 3  ;;  %v994_v21 = vmul.f32 %v992_v45, %v2145_v16  ;;  %v1118_v33 = vpop.permute.xlu2 %1117 }
 0x39a   : > { %v995_v32 = vmul.f32 %v993_v62, %v2145_v16  ;;  %v1004_v25 = vmul.f32 %v1002_v29, %v2165_v12  ;;  %v1005_v53 = vmul.f32 %v1003_v48, %v2165_v12  ;;  %v1023_v31 = vperm.slane %v2041_v28, 0 }
 0x39b   : > { %v935_v38 = vadd.f32 %v933_v17, %v925_v55  ;;  %v936_v50 = vadd.f32 %v934_v13, %v926_v35  ;;  %v1024_v2 = vperm.slane %v2043_v11, 0  ;;  %v1014_v20 = vmul.f32 %v1012_v26, %v2163_v59 }
 0x39c   : > { %v2244_v19 = vpop.permute.xlu0 %1063  ;;  %v1015_v49 = vmul.f32 %v1013_v6, %v2163_v59  ;;  %v1033_v16 = vperm.slane %v2041_v28, 1  ;;  %v1034_v17 = vperm.slane %v2043_v11, 1  ;;  %v1025_v13 = vmul.f32 %v1023_v31, %v2167_v43 }
 0x39d   : > { %v945_v14 = vadd.f32 %v943_v58, %v935_v38  ;;  %v946_v24 = vadd.f32 %v944_v0, %v936_v50  ;;  %v1026_v12 = vmul.f32 %v1024_v2, %v2167_v43  ;;  %v1059_v58 = vsel %vm370_vm12, %v965_v57, %v2215_v63 }
 0x39e   : > { %v1060_v59 = vsel %vm371_vm13, %v2224_v52, %v2219_v18  ;;  %v1043_v0 = vperm.slane %v2041_v28, 2  ;;  %v1044_v45 = vperm.slane %v2043_v11, 2  ;;  %v1035_v8 = vmul.f32 %v1033_v16, %v2173_v56 }
 0x39f   : > { %v955_v22 = vadd.f32 %v953_v39, %v945_v14  ;;  %v956_v23 = vadd.f32 %v954_v7, %v946_v24  ;;  %v2248_v41 = vpop.permute.xlu1 %1093  ;;  %v1036_v43 = vmul.f32 %v1034_v17, %v2173_v56  ;;  %v1053_v24 = vperm.slane %v2041_v28, 3 }
 0x3a0   : > { %v1054_v63 = vperm.slane %v2043_v11, 3  ;;  %v1045_v57 = vmul.f32 %v1043_v0, %v2171_v60  ;;  %v1046_v18 = vmul.f32 %v1044_v45, %v2171_v60  ;;  %v1076_v7 = vperm.slane %v1059_v58, 1 }
 0x3a1   : > { %v986_v30 = vadd.f32 %v984_v42, %v955_v22  ;;  %v987_v27 = vadd.f32 %v985_v44, %v956_v23  ;;  %v1077_v29 = vperm.slane %v1060_v59, 1  ;;  %v1066_v48 = vperm.slane %v1059_v58, 0  ;;  %v1170_v11 = vpop.permute.xlu2 %1169 }
 0x3a2   : > { %v1067_v22 = vperm.slane %v1060_v59, 0  ;;  %v1055_v23 = vmul.f32 %v1053_v24, %v2193_v51  ;;  %v1056_v56 = vmul.f32 %v1054_v63, %v2193_v51  ;;  %v1086_v28 = vperm.slane %v1059_v58, 2 }
 0x3a3   : > { %v996_v10 = vadd.f32 %v994_v21, %v986_v30  ;;  %v997_v5 = vadd.f32 %v995_v32, %v987_v27  ;;  %v1087_v6 = vperm.slane %v1060_v59, 2  ;;  %v1096_v30 = vperm.slane %v1059_v58, 3 }
 0x3a4   : > { %v2256_v3 = vpop.permute.xlu0 %1128  ;;  %v1097_v27 = vperm.slane %v1060_v59, 3  ;;  %v1068_v32 = vmul.f32 %v1066_v48, %v2244_v19 }
 0x3a5   : > { %v1006_v55 = vadd.f32 %v1004_v25, %v996_v10  ;;  %v1007_v35 = vadd.f32 %v1005_v53, %v997_v5  ;;  %v1069_v10 = vmul.f32 %v1067_v22, %v2244_v19  ;;  %v1078_v5 = vmul.f32 %v1076_v7, %v2179_v61 }
 0x3a6   : > { %v1079_v25 = vmul.f32 %v1077_v29, %v2179_v61  ;;  %v1089_v19 = vmul.f32 %v1087_v6, %v2229_v54  ;;  %v1099_v0 = vmul.f32 %v1097_v27, %v2248_v41 }
 0x3a7   : > { %v1016_v38 = vadd.f32 %v1014_v20, %v1006_v55  ;;  %v1017_v50 = vadd.f32 %v1015_v49, %v1007_v35  ;;  %v1088_v35 = vmul.f32 %v1086_v28, %v2229_v54  ;;  %v1183_v28 = vperm.slane %v2112_v9, 1 }
 0x3a8   : > { %v2273_v62 = vpop.permute.xlu1 %1148 }
 0x3a9   : > { %v1027_v47 = vadd.f32 %v1025_v13, %v1016_v38  ;;  %v1028_v14 = vadd.f32 %v1026_v12, %v1017_v50 }
 0x3ab   : > { %v1037_v52 = vadd.f32 %v1035_v8, %v1027_v47  ;;  %v1038_v39 = vadd.f32 %v1036_v43, %v1028_v14  ;;  %v1190_v47 = vpop.permute.xlu2 %1189 }
 0x3ac   : > { %v1116_v26 = vpop.permute.xlu0 %1115 }
 0x3ad   : > { %v1047_v42 = vadd.f32 %v1045_v57, %v1037_v52  ;;  %v1048_v44 = vadd.f32 %v1046_v18, %v1038_v39  ;;  %v1119_v51 = vsel %vm268_vm8, %v1116_v26, %v1118_v33  ;;  %v1123_v53 = vsel %vm268_vm8, %v1118_v33, %v1116_v26 }
 0x3ae   : > { %v1182_v26 = vperm.slane %v2122_v34, 1 }
 0x3af   : > { %v1057_v21 = vadd.f32 %v1055_v23, %v1047_v42  ;;  %v1058_v60 = vadd.f32 %v1056_v56, %v1048_v44  ;;  %v1172_v23 = vperm.slane %v2122_v34, 0 }
 0x3b0   : > { %v1110_v31 = vpop.permute.xlu1 %1109 }
 0x3b1   : > { %v1070_v2 = vadd.f32 %v1068_v32, %v1057_v21  ;;  %v1071_v20 = vadd.f32 %v1069_v10, %v1058_v60  ;;  %v1111_v49 = vsel %vm259_vm9, %v1110_v31, %v2240_v1  ;;  %v1114_v55 = vsel %vm259_vm9, %v2240_v1, %v1110_v31 }
 0x3b2   : > { %v1124_v61 = vsel %vm278_vm10, %v1119_v51, %v1114_v55  ;;  %v1125_v16 = vsel %vm279_vm11, %v1123_v53, %v1111_v49  ;;  %v1098_v1 = vmul.f32 %v1096_v30, %v2248_v41  ;;  %v1174_v6 = vmul.f32 %v1172_v23, %v1170_v11 }
 0x3b3   : > { %v1080_v33 = vadd.f32 %v1078_v5, %v1070_v2  ;;  %v1081_v17 = vadd.f32 %v1079_v25, %v1071_v20  ;;  %v1131_v13 = vperm.slane %v1124_v61, 0  ;;  %v1132_v12 = vperm.slane %v1125_v16, 0  ;;  %v1223_v5 = vpop.permute.xlu2 %1222 }
 0x3b4   : > { %v1141_v38 = vperm.slane %v1124_v61, 1  ;;  %v1142_v50 = vperm.slane %v1125_v16, 1  ;;  %v1151_v45 = vperm.slane %v1124_v61, 2  ;;  %v1152_v54 = vperm.slane %v1125_v16, 2  ;;  %v1159_v7 = vpop.permute.xlu0 %1158 }
 0x3b5   : > { %v1090_v58 = vadd.f32 %v1088_v35, %v1080_v33  ;;  %v1091_v59 = vadd.f32 %v1089_v19, %v1081_v17  ;;  %v1133_v43 = vmul.f32 %v1131_v13, %v2256_v3  ;;  %v1134_v37 = vmul.f32 %v1132_v12, %v2256_v3 }
 0x3b6   : > { %v1143_v14 = vmul.f32 %v1141_v38, %v2199_v15  ;;  %v1144_v24 = vmul.f32 %v1142_v50, %v2199_v15  ;;  %v1161_v52 = vperm.slane %v1124_v61, 3  ;;  %v1162_v39 = vperm.slane %v1125_v16, 3 }
 0x3b7   : > { %v1100_v8 = vadd.f32 %v1098_v1, %v1090_v58  ;;  %v1101_v36 = vadd.f32 %v1099_v0, %v1091_v59  ;;  %v1153_v48 = vmul.f32 %v1151_v45, %v2273_v62  ;;  %v1154_v22 = vmul.f32 %v1152_v54, %v2273_v62 }
 0x3b8   : > { %v1180_v63 = vpop.permute.xlu1 %1179  ;;  %v1173_v3 = vperm.slane %v2112_v9, 0  ;;  %v1163_v44 = vmul.f32 %v1161_v52, %v1159_v7  ;;  %v1164_v15 = vmul.f32 %v1162_v39, %v1159_v7  ;;  %v1192_v60 = vperm.slane %v2122_v34, 2 }
 0x3b9   : > { %v1135_v57 = vadd.f32 %v1133_v43, %v1100_v8  ;;  %v1136_v18 = vadd.f32 %v1134_v37, %v1101_v36  ;;  %v1193_v62 = vperm.slane %v2112_v9, 2  ;;  %v1208_v32 = vsel %vm370_vm12, %v1114_v55, %v1119_v51 }
 0x3ba   : > { %v1175_v30 = vmul.f32 %v1173_v3, %v1170_v11  ;;  %v1209_v10 = vsel %vm371_vm13, %v1111_v49, %v1123_v53  ;;  %v1184_v2 = vmul.f32 %v1182_v26, %v1180_v63  ;;  %v1185_v20 = vmul.f32 %v1183_v28, %v1180_v63 }
 0x3bb   : > { %v1145_v41 = vadd.f32 %v1143_v14, %v1135_v57  ;;  %v1146_v29 = vadd.f32 %v1144_v24, %v1136_v18  ;;  %v1202_v11 = vperm.slane %v2122_v34, 3  ;;  %v1203_v19 = vperm.slane %v2112_v9, 3  ;;  %v1243_v36 = vpop.permute.xlu2 %1242 }
 0x3bc   : > { %v1194_v61 = vmul.f32 %v1192_v60, %v1190_v47  ;;  %v1195_v16 = vmul.f32 %v1193_v62, %v1190_v47  ;;  %v1225_v13 = vperm.slane %v1208_v32, 1  ;;  %v1226_v40 = vperm.slane %v1209_v10, 1 }
 0x3bd   : > { %v1155_v56 = vadd.f32 %v1153_v48, %v1145_v41  ;;  %v1156_v42 = vadd.f32 %v1154_v22, %v1146_v29  ;;  %v1213_v51 = vpop.permute.xlu0 %1212  ;;  %v1215_v55 = vperm.slane %v1208_v32, 0  ;;  %v1216_v46 = vperm.slane %v1209_v10, 0 }
 0x3be   : > { %v1227_v34 = vmul.f32 %v1225_v13, %v1223_v5  ;;  %v1228_v0 = vmul.f32 %v1226_v40, %v1223_v5  ;;  %v1235_v54 = vperm.slane %v1208_v32, 2  ;;  %v1236_v8 = vperm.slane %v1209_v10, 2 }
 0x3bf   : > { %v1165_v27 = vadd.f32 %v1163_v44, %v1155_v56  ;;  %v1166_v21 = vadd.f32 %v1164_v15, %v1156_v42  ;;  %v1217_v50 = vmul.f32 %v1215_v55, %v1213_v51  ;;  %v1218_v58 = vmul.f32 %v1216_v46, %v1213_v51 }
 0x3c0   : > { %v1245_v43 = vperm.slane %v1208_v32, 3  ;;  %v1246_v37 = vperm.slane %v1209_v10, 3 }
 0x3c1   : > { %v1176_v25 = vadd.f32 %v1174_v6, %v1165_v27  ;;  %v1177_v31 = vadd.f32 %v1175_v30, %v1166_v21  ;;  %v1200_v35 = vpop.permute.xlu1 %1199 }
 0x3c2   : > { %v1204_v12 = vmul.f32 %v1202_v11, %v1200_v35  ;;  %v1205_v38 = vmul.f32 %v1203_v19, %v1200_v35  ;;  %v1247_v18 = vmul.f32 %v1245_v43, %v1243_v36  ;;  %v1248_v52 = vmul.f32 %v1246_v37, %v1243_v36 }
 0x3c3   : > { %v1186_v33 = vadd.f32 %v1184_v2, %v1176_v25  ;;  %v1187_v17 = vadd.f32 %v1185_v20, %v1177_v31 }
 0x3c5   : > { %v1196_v53 = vadd.f32 %v1194_v61, %v1186_v33  ;;  %v1197_v49 = vadd.f32 %v1195_v16, %v1187_v17 }
 0x3c7   : > { %v1206_v59 = vadd.f32 %v1204_v12, %v1196_v53  ;;  %v1207_v1 = vadd.f32 %v1205_v38, %v1197_v49 }
 0x3c9   : > { %v1219_v9 = vadd.f32 %v1217_v50, %v1206_v59  ;;  %v1220_v45 = vadd.f32 %v1218_v58, %v1207_v1 }
 0x3ca   : > { %v1233_v47 = vpop.permute.xlu1 %1232 }
 0x3cb   : > { %v1229_v14 = vadd.f32 %v1227_v34, %v1219_v9  ;;  %v1230_v24 = vadd.f32 %v1228_v0, %v1220_v45  ;;  %v1237_v63 = vmul.f32 %v1235_v54, %v1233_v47  ;;  %v1238_v57 = vmul.f32 %v1236_v8, %v1233_v47 }
 0x3cd   : > { %v1239_v39 = vadd.f32 %v1237_v63, %v1229_v14  ;;  %v1240_v7 = vadd.f32 %v1238_v57, %v1230_v24 }
 0x3cf   : > { %v1249_v41 = vadd.f32 %v1247_v18, %v1239_v39  ;;  %v1250_v29 = vadd.f32 %v1248_v52, %v1240_v7 }
 0x3d1   : > { %v1251_v48 = vsel %vm745_vm14, %v1249_v41, 0.0  ;;  %v1252_v22 = vsel %vm745_vm14, %v1250_v29, 0.0 }
 0x3d2   : > { %v1253_v23 = vadd.f32 %v1252_v22, %v1251_v48 }
 0x3d4   : > { %1254 = vadd.xlane.f32.xlu1 %v1253_v23 }
 0x447   : > { %v1255_v3 = vpop.xlane.xlu1 %1254 }
 0x448   : > { %v1256_v56 = vmul.f32 0.00390625, %v1255_v3 }
 0x44a   : > { %v1257_v42 = vsub.f32 %v1249_v41, %v1256_v56  ;;  %v1258_v44 = vsub.f32 %v1250_v29, %v1256_v56 }
 0x44c   : > { %v1259_v15 = vmul.f32 %v1257_v42, %v1257_v42  ;;  %v1260_v26 = vmul.f32 %v1258_v44, %v1258_v44 }
 0x44e   : > { %v1261_v28 = vsel %vm745_vm14, %v1259_v15, 0.0  ;;  %v1262_v6 = vsel %vm745_vm14, %v1260_v26, 0.0 }
 0x44f   : > { %v1263_v30 = vadd.f32 %v1262_v6, %v1261_v28 }
 0x451   : > { %1264 = vadd.xlane.f32.xlu0 %v1263_v30 }
 0x4c4   : > { %v1265_v27 = vpop.xlane.xlu0 %1264 }
 0x4c5   : > { %v1266_v21 = vmul.f32 0.00390625, %v1265_v27 }
 0x4c7   : > { %v1267_v60 = vadd.f32 1e-05, %v1266_v21 }
 0x4c9   : > { %1489 = vrsqrt.f32 %v1267_v60  ;;  %vm1274_vm2 = vweird.f32 %v1267_v60 }
 0x4cf   : > { %v1490_v62 = vpop.eup %1489 }
 0x4d0   : > { %v1269_v32 = vmul.f32 %v1490_v62, %v1267_v60  ;;  %vm1275_vm1 = vweird.f32 %v1490_v62 }
 0x4d1   : > { %vm1276_vm3 = vmor %vm1274_vm2, %vm1275_vm1 }
 0x4d2   : > { %v1270_v10 = vmul.f32 %v1490_v62, %v1269_v32 }
 0x4d4   : > { %v1271_v5 = vmul.f32 0.5, %v1270_v10 }
 0x4d6   : > { %v1272_v25 = vsub.f32 1.5, %v1271_v5 }
 0x4d8   : > { %v1273_v31 = vmul.f32 %v1490_v62, %v1272_v25 }
 0x4da   : > { %v1277_v2 = vsel %vm1276_vm3, %v1490_v62, %v1273_v31 }
 0x4db   : > { %v1279_v20 = vmul.f32 %v1277_v2, %v1258_v44  ;;  %v1278_v35 = vmul.f32 %v1277_v2, %v1257_v42 }
 0x4dd   : > { %v1282_v11 = vrot.slane %v1279_v20, 4 }
 0x4df   : > { %v1283_v19 = vsel %vm745_vm14, %v1278_v35, %v1282_v11 }
 0x4e0   : > { %v1285_v61 = vadd.f32 %v1283_v19, %v1647_v4 }
 0x4e2   : > { %1286 = vst [vmem:[%s190_s7] sm:$0xff] %v1285_v61 }
 0x4e3   : > { %1518 = shalt.err (!%p1515_p3)
}
 0x4e4   : > { %1377 = dma.vmem_to_hbm [thread:$0]  (%p1626_p5), %s1302_s10, 128, %s1304_s11, %s1288_s19  }
 0x4e5 PF: > { %p1383_p4 = scmp.ge.s32.totalorder %s1553_s18, 2  ;;  %s1315_s28 = sand.u32 1, %s1541_s15  }
 0x4e6   : > { %s1316_s14 = scalar_lea.sflag [#allocation3], %s1315_s28 }
 0x4e7   : > { %p1380_p7 = pnand %p1383_p4, %p1630_p6 }
 0x4e9   : > { %p1381_p8 = pneg %p1380_p7 }
 0x4eb   : > { %1536 = dma.done.wait (%p1381_p8), %s1316_s14, 128  }
 0x4ec   : > { %1538 = vsyncadd (%p1381_p8), %s1316_s14, 4294967168  ;;  %p14_p9 = scmp.ge.s32.totalorder %s1613_s21, 4   ;;  %s2379_s15 = smov %s1545_s16 }
 0x4ed   : > { %s2380_s16 = smov %s1549_s17  ;;  %s2381_s17 = smov %s1624_s24 }
 0x4ee   : > { %s2382_s18 = smov %s1613_s21  ;;  %16 = sbr.rel (!%p14_p9) target bundleno = 3 (0x3), region = 71 }
 0x4f3   :  { %1322 = vsyncpa [#allocation3], 1 }
 0x4f4   :  { %1324 = vsyncpa [#allocation3 + $0x1], 1 }

</bundles_post_ra>
